<compile_context>
chip_gen: v5e
topology: v5e:2x2
jax: 0.10.0
libtpu: 0.0.40
codegen_flags: <defaults>
</compile_context>

<pallas_src>
import functools
import math

import jax
import jax.numpy as jnp
from jax import lax
from jax.experimental import pallas as pl
from jax.experimental.pallas import tpu as pltpu


# ----------------------------------------------------------------------------
# Generation-aware sizing (v5e/v6e: 128 MiB VMEM, v7x: 64 MiB per TC)
# ----------------------------------------------------------------------------

def _vmem_capacity_bytes():
    try:
        info = pltpu.get_tpu_info()
        cap = getattr(info, "vmem_capacity_bytes", None)
        if cap:
            return int(cap)
    except Exception:
        pass
    return 64 * 1024 * 1024  # conservative fallback (v7x-sized)


_VMEM_CAP = _vmem_capacity_bytes()
_VMEM_LIMIT = min((_VMEM_CAP * 3) // 4, 96 * 1024 * 1024)      # 96 MiB v5e/v6e, 48 MiB v7x
_MAX_ROW_TILE = 512 if _VMEM_CAP > 64 * 1024 * 1024 else 256   # multiples of 256 fill the MXU
_MAX_F_TILE = 1024 if _VMEM_CAP > 64 * 1024 * 1024 else 512

_COMPUTE_DTYPE = jnp.bfloat16   # MXU operand / activation dtype


def _cp(semantics):
    return pltpu.CompilerParams(
        dimension_semantics=semantics,
        vmem_limit_bytes=int(_VMEM_LIMIT),
    )


def _row_tile(m):
    """Full-M block if it fits, else a fixed 256/512-row tile (ragged tail is masked)."""
    if m <= _MAX_ROW_TILE:
        return m
    return _MAX_ROW_TILE


def _f_tile(f):
    """Hidden-dim tile for the FFN: full F if small, else a 128-multiple divisor."""
    if f <= _MAX_F_TILE:
        return f
    t = (_MAX_F_TILE // 128) * 128
    while t >= 128:
        if f % t == 0:
            return t
        t -= 128
    return f  # TODO(synk): masked F-tail accumulation for F not divisible by 128


# ----------------------------------------------------------------------------
# Kernel bodies
# ----------------------------------------------------------------------------

def _self_qkv_kernel(*refs, has_pe):
    """q,k = (x+pe) @ Wqk + bqk (split); v = x @ Wv + bv.  One HBM read of x/pe."""
    if has_pe:
        x_ref, pe_ref, wqk_ref, bqk_ref, wv_ref, bv_ref, q_ref, k_ref, v_ref = refs
        xpe = x_ref[...].astype(jnp.float32) + pe_ref[...].astype(jnp.float32)
    else:
        x_ref, wqk_ref, bqk_ref, wv_ref, bv_ref, q_ref, k_ref, v_ref = refs
        xpe = x_ref[...].astype(jnp.float32)
    E = q_ref.shape[-1]
    qk = jnp.dot(xpe.astype(wqk_ref.dtype), wqk_ref[...],
                 preferred_element_type=jnp.float32) + bqk_ref[...]
    q_ref[...] = qk[:, :E].astype(q_ref.dtype)
    k_ref[...] = qk[:, E:].astype(k_ref.dtype)
    v = jnp.dot(x_ref[...].astype(wv_ref.dtype), wv_ref[...],
                preferred_element_type=jnp.float32) + bv_ref[...]
    v_ref[...] = v.astype(v_ref.dtype)


def _cross_kv_kernel(*refs, has_pe):
    """k = (mem+pos) @ Wk + bk; v = mem @ Wv + bv.  One HBM read of mem/pos."""
    if has_pe:
        x_ref, pe_ref, wk_ref, bk_ref, wv_ref, bv_ref, k_ref, v_ref = refs
        xpe = x_ref[...].astype(jnp.float32) + pe_ref[...].astype(jnp.float32)
    else:
        x_ref, wk_ref, bk_ref, wv_ref, bv_ref, k_ref, v_ref = refs
        xpe = x_ref[...].astype(jnp.float32)
    k = jnp.dot(xpe.astype(wk_ref.dtype), wk_ref[...],
                preferred_element_type=jnp.float32) + bk_ref[...]
    k_ref[...] = k.astype(k_ref.dtype)
    v = jnp.dot(x_ref[...].astype(wv_ref.dtype), wv_ref[...],
                preferred_element_type=jnp.float32) + bv_ref[...]
    v_ref[...] = v.astype(v_ref.dtype)


def _attn_kernel(q_ref, k_ref, v_ref, o_ref, *w_refs, nhead, dh, scale,
                 return_weights):
    """Per-batch MHA on lane-dense (L, E) blocks; heads unrolled.
    No explicit transposes (dot_general contracts the head dim) and no concat
    (direct per-head lane-slice stores).  Softmax recip on the EUP."""
    q = q_ref[0]            # (Lq, E)
    k = k_ref[0]            # (Lk, E)
    v = v_ref[0]            # (Lk, E)
    if return_weights:
        a_ref, avg_ref = w_refs
        p_acc = None
    for h in range(nhead):  # static unroll; all heads share the loaded block
        lo, hi = h * dh, (h + 1) * dh
        s = lax.dot_general(q[:, lo:hi], k[:, lo:hi],
                            (((1,), (1,)), ((), ())),
                            preferred_element_type=jnp.float32) * scale
        s = s - jnp.max(s, axis=-1, keepdims=True)
        p = jnp.exp(s)
        p = p * pl.reciprocal(jnp.sum(p, axis=-1, keepdims=True), approx=True)
        o_h = jnp.dot(p.astype(v.dtype), v[:, lo:hi],
                      preferred_element_type=jnp.float32)
        o_ref[0, :, lo:hi] = o_h.astype(o_ref.dtype)
        if return_weights:
            a_ref[0, h] = p.astype(a_ref.dtype)
            p_acc = p if p_acc is None else p_acc + p
    if return_weights:
        avg_ref[0] = (p_acc * (1.0 / nhead)).astype(avg_ref.dtype)


def _proj_ln_kernel(*refs, eps, fuse_q, has_pe):
    """t = LayerNorm(res + x @ Wo + bo); optionally q = (t [+ pe]) @ Wq + bq."""
    if fuse_q:
        if has_pe:
            (x_ref, res_ref, wo_ref, bo_ref, g_ref, be_ref,
             pe_ref, wq_ref, bq_ref, t_ref, q_ref) = refs
        else:
            (x_ref, res_ref, wo_ref, bo_ref, g_ref, be_ref,
             wq_ref, bq_ref, t_ref, q_ref) = refs
    else:
        x_ref, res_ref, wo_ref, bo_ref, g_ref, be_ref, t_ref = refs
    y = jnp.dot(x_ref[...], wo_ref[...], preferred_element_type=jnp.float32)
    y = y + bo_ref[...] + res_ref[...].astype(jnp.float32)
    mean = jnp.mean(y, axis=-1, keepdims=True)
    var = jnp.mean((y - mean) ** 2, axis=-1, keepdims=True)
    t = (y - mean) * lax.rsqrt(var + eps) * g_ref[...] + be_ref[...]
    t_ref[...] = t.astype(t_ref.dtype)
    if fuse_q:
        qin = t + pe_ref[...].astype(jnp.float32) if has_pe else t
        qv = jnp.dot(qin.astype(wq_ref.dtype), wq_ref[...],
                     preferred_element_type=jnp.float32) + bq_ref[...]
        q_ref[...] = qv.astype(q_ref.dtype)


def _ffn_ln_kernel(x_ref, w1_ref, b1_ref, w2_ref, b2_ref, g_ref, be_ref,
                   o_ref, acc_ref, *, eps):
    """o = LayerNorm(x + relu(x @ W1 + b1) @ W2 + b2), tiled over the hidden dim F."""
    j = pl.program_id(1)

    @pl.when(j == 0)
    def _():
        acc_ref[...] = jnp.zeros_like(acc_ref)

    x = x_ref[...]
    h = jnp.dot(x, w1_ref[...], preferred_element_type=jnp.float32) + b1_ref[...]
    h = jnp.maximum(h, 0.0).astype(x.dtype)
    acc_ref[...] += jnp.dot(h, w2_ref[...], preferred_element_type=jnp.float32)

    @pl.when(j == pl.num_programs(1) - 1)
    def _():
        y = acc_ref[...] + b2_ref[...] + x.astype(jnp.float32)
        mean = jnp.mean(y, axis=-1, keepdims=True)
        var = jnp.mean((y - mean) ** 2, axis=-1, keepdims=True)
        yn = (y - mean) * lax.rsqrt(var + eps)
        o_ref[...] = (yn * g_ref[...] + be_ref[...]).astype(o_ref.dtype)


# ----------------------------------------------------------------------------
# pallas_call wrappers
# ----------------------------------------------------------------------------

def self_qkv_proj(x, pe, wqk, bqk, wv, bv):
    """x/pe: [M, E]; returns (q, k, v) each [M, E] in the compute dtype."""
    M, E = x.shape
    rt = _row_tile(M)
    row = lambda i: (i, 0)
    cst = lambda i: (0, 0)
    in_specs = [pl.BlockSpec((rt, E), row)]
    ops = [x]
    if pe is not None:
        in_specs.append(pl.BlockSpec((rt, E), row))
        ops.append(pe)
    in_specs += [pl.BlockSpec((E, 2 * E), cst), pl.BlockSpec((1, 2 * E), cst),
                 pl.BlockSpec((E, E), cst), pl.BlockSpec((1, E), cst)]
    ops += [wqk, bqk, wv, bv]
    return pl.pallas_call(
        functools.partial(_self_qkv_kernel, has_pe=pe is not None),
        out_shape=(jax.ShapeDtypeStruct((M, E), _COMPUTE_DTYPE),) * 3,
        grid=(pl.cdiv(M, rt),),
        in_specs=in_specs,
        out_specs=(pl.BlockSpec((rt, E), row),) * 3,
        compiler_params=_cp(("parallel",)),
    )(*ops)


def cross_kv_proj(x, pe, wk, bk, wv, bv):
    """x/pe: [M, E]; returns (k, v) each [M, E] in the compute dtype."""
    M, E = x.shape
    rt = _row_tile(M)
    row = lambda i: (i, 0)
    cst = lambda i: (0, 0)
    in_specs = [pl.BlockSpec((rt, E), row)]
    ops = [x]
    if pe is not None:
        in_specs.append(pl.BlockSpec((rt, E), row))
        ops.append(pe)
    in_specs += [pl.BlockSpec((E, E), cst), pl.BlockSpec((1, E), cst),
                 pl.BlockSpec((E, E), cst), pl.BlockSpec((1, E), cst)]
    ops += [wk, bk, wv, bv]
    return pl.pallas_call(
        functools.partial(_cross_kv_kernel, has_pe=pe is not None),
        out_shape=(jax.ShapeDtypeStruct((M, E), _COMPUTE_DTYPE),) * 2,
        grid=(pl.cdiv(M, rt),),
        in_specs=in_specs,
        out_specs=(pl.BlockSpec((rt, E), row),) * 2,
        compiler_params=_cp(("parallel",)),
    )(*ops)


def mha_batched(q, k, v, nhead, return_weights):
    """q: (N, Lq, E), k/v: (N, Lk, E).  Grid over batch; all heads per step."""
    N, Lq, E = q.shape
    Lk = k.shape[1]
    dh = E // nhead
    scale = 1.0 / math.sqrt(dh)
    in_specs = [pl.BlockSpec((1, Lq, E), lambda n: (n, 0, 0)),
                pl.BlockSpec((1, Lk, E), lambda n: (n, 0, 0)),
                pl.BlockSpec((1, Lk, E), lambda n: (n, 0, 0))]
    if return_weights:
        # weights kept in f32 for downstream consumers (returned by the module)
        out_shape = (jax.ShapeDtypeStruct((N, Lq, E), q.dtype),
                     jax.ShapeDtypeStruct((N, nhead, Lq, Lk), jnp.float32),
                     jax.ShapeDtypeStruct((N, Lq, Lk), jnp.float32))
        out_specs = (pl.BlockSpec((1, Lq, E), lambda n: (n, 0, 0)),
                     pl.BlockSpec((1, nhead, Lq, Lk), lambda n: (n, 0, 0, 0)),
                     pl.BlockSpec((1, Lq, Lk), lambda n: (n, 0, 0)))
    else:
        out_shape = jax.ShapeDtypeStruct((N, Lq, E), q.dtype)
        out_specs = pl.BlockSpec((1, Lq, E), lambda n: (n, 0, 0))
    return pl.pallas_call(
        functools.partial(_attn_kernel, nhead=nhead, dh=dh, scale=scale,
                          return_weights=return_weights),
        out_shape=out_shape,
        grid=(N,),
        in_specs=in_specs,
        out_specs=out_specs,
        compiler_params=_cp(("parallel",)),
    )(q, k, v)


def proj_add_layernorm(x, res, wo, bo, gamma, beta, *, eps=1e-5, fused_q=None):
    """LayerNorm(res + x @ wo + bo); if fused_q=(pe, wq, bq) also returns
    the cross-attention query projection of the normalized output."""
    M, E = x.shape
    rt = _row_tile(M)
    row = lambda i: (i, 0)
    cst = lambda i: (0, 0)
    in_specs = [pl.BlockSpec((rt, E), row), pl.BlockSpec((rt, E), row),
                pl.BlockSpec((E, E), cst), pl.BlockSpec((1, E), cst),
                pl.BlockSpec((1, E), cst), pl.BlockSpec((1, E), cst)]
    ops = [x, res, wo, bo, gamma, beta]
    fuse_q = fused_q is not None
    has_pe = False
    if fuse_q:
        pe, wq, bq = fused_q
        has_pe = pe is not None
        if has_pe:
            in_specs.append(pl.BlockSpec((rt, E), row))
            ops.append(pe)
        in_specs += [pl.BlockSpec((E, E), cst), pl.BlockSpec((1, E), cst)]
        ops += [wq, bq]
        out_shape = (jax.ShapeDtypeStruct((M, E), _COMPUTE_DTYPE),
                     jax.ShapeDtypeStruct((M, E), _COMPUTE_DTYPE))
        out_specs = (pl.BlockSpec((rt, E), row), pl.BlockSpec((rt, E), row))
    else:
        out_shape = jax.ShapeDtypeStruct((M, E), _COMPUTE_DTYPE)
        out_specs = pl.BlockSpec((rt, E), row)
    return pl.pallas_call(
        functools.partial(_proj_ln_kernel, eps=eps, fuse_q=fuse_q, has_pe=has_pe),
        out_shape=out_shape,
        grid=(pl.cdiv(M, rt),),
        in_specs=in_specs,
        out_specs=out_specs,
        compiler_params=_cp(("parallel",)),
    )(*ops)


def ffn_layernorm(x, w1, b1, w2, b2, gamma, beta, *, eps=1e-5, out_dtype=None):
    """LayerNorm(x + relu(x @ w1 + b1) @ w2 + b2), tiled over rows and F."""
    M, E = x.shape
    F = w1.shape[1]
    rt = _row_tile(M)
    tf = _f_tile(F)
    row = lambda i, j: (i, 0)
    return pl.pallas_call(
        functools.partial(_ffn_ln_kernel, eps=eps),
        out_shape=jax.ShapeDtypeStruct((M, E), out_dtype or x.dtype),
        grid=(pl.cdiv(M, rt), F // tf),
        in_specs=[pl.BlockSpec((rt, E), row),
                  pl.BlockSpec((E, tf), lambda i, j: (0, j)),
                  pl.BlockSpec((1, tf), lambda i, j: (0, j)),
                  pl.BlockSpec((tf, E), lambda i, j: (j, 0)),
                  pl.BlockSpec((1, E), lambda i, j: (0, 0)),
                  pl.BlockSpec((1, E), lambda i, j: (0, 0)),
                  pl.BlockSpec((1, E), lambda i, j: (0, 0))],
        out_specs=pl.BlockSpec((rt, E), row),
        scratch_shapes=[pltpu.VMEM((rt, E), jnp.float32)],
        compiler_params=_cp(("parallel", "arbitrary")),
    )(x, w1, b1, w2, b2, gamma, beta)


# ----------------------------------------------------------------------------
# TransformerDecoderLayer forward_post (normalize_before=False, eval mode)
# ----------------------------------------------------------------------------

def transformer_decoder_layer(tgt, memory, kp, nhead, pos=None, query_pos=None,
                              eps=1e-5):
    L, N, E = tgt.shape
    Lm = memory.shape[0]

    # single layout change to batch-major; everything below is lane-dense (.., E)
    # TODO(synk): fold these boundary transposes into the edge kernels' index maps.
    tgt_rows = jnp.transpose(tgt, (1, 0, 2)).reshape(N * L, E)
    mem_rows = jnp.transpose(memory, (1, 0, 2)).reshape(N * Lm, E)
    qp_rows = (None if query_pos is None
               else jnp.transpose(query_pos, (1, 0, 2)).reshape(N * L, E))
    pos_rows = (None if pos is None
                else jnp.transpose(pos, (1, 0, 2)).reshape(N * Lm, E))

    # --- self attention (q = k = tgt + query_pos, v = tgt) -------------------
    sa = kp["self_attn"]
    ca = kp["multihead_attn"]
    q, k, v = self_qkv_proj(tgt_rows, qp_rows, sa["wqk"], sa["bqk"],
                            sa["wv"], sa["bv"])
    attn = mha_batched(q.reshape(N, L, E), k.reshape(N, L, E), v.reshape(N, L, E),
                       nhead, return_weights=False)       # weights discarded
    # out-proj + residual(tgt) + norm1 + cross-attn Q projection, fused
    # (dropout1 = identity)
    tgt_rows, q_cross = proj_add_layernorm(
        attn.reshape(N * L, E), tgt_rows, sa["wo"], sa["bo"],
        kp["norm1_g"], kp["norm1_b"], eps=eps,
        fused_q=(qp_rows, ca["wq"], ca["bq"]))

    # --- cross attention ------------------------------------------------------
    k, v = cross_kv_proj(mem_rows, pos_rows, ca["wk"], ca["bk"], ca["wv"], ca["bv"])
    attn, attn_full, attn_avg = mha_batched(
        q_cross.reshape(N, L, E), k.reshape(N, Lm, E), v.reshape(N, Lm, E),
        nhead, return_weights=True)
    # out-proj + residual + norm2, fused               (dropout2 = identity)
    tgt_rows = proj_add_layernorm(attn.reshape(N * L, E), tgt_rows,
                                  ca["wo"], ca["bo"],
                                  kp["norm2_g"], kp["norm2_b"], eps=eps)

    # --- feed-forward + residual + norm3, fused (dropout, dropout3 = identity)
    out_rows = ffn_layernorm(tgt_rows, kp["linear1_w"], kp["linear1_b"],
                             kp["linear2_w"], kp["linear2_b"],
                             kp["norm3_g"], kp["norm3_b"], eps=eps,
                             out_dtype=tgt.dtype)

    out = jnp.transpose(out_rows.reshape(N, L, E), (1, 0, 2))   # back to (L, N, E)
    return out, attn_full, attn_avg


# ----------------------------------------------------------------------------
# Deterministic parameter init (torch layout) + one-time kernel-layout prep
# ----------------------------------------------------------------------------

def init_params(key, d_model, nhead, dim_feedforward):
    """Parameters in torch layout: Linear weights are (out_features, in_features)."""
    keys = jax.random.split(key, 12)
    s = 0.02

    def attn_params(k0, k1, k2, k3):
        return {
            "in_w": jax.random.normal(k0, (3 * d_model, d_model), jnp.float32) * s,
            "in_b": jax.random.normal(k1, (3 * d_model,), jnp.float32) * s,
            "out_w": jax.random.normal(k2, (d_model, d_model), jnp.float32) * s,
            "out_b": jax.random.normal(k3, (d_model,), jnp.float32) * s,
        }

    return {
        "self_attn": attn_params(*keys[0:4]),
        "multihead_attn": attn_params(*keys[4:8]),
        "linear1_w": jax.random.normal(keys[8], (dim_feedforward, d_model), jnp.float32) * s,
        "linear1_b": jax.random.normal(keys[9], (dim_feedforward,), jnp.float32) * s,
        "linear2_w": jax.random.normal(keys[10], (d_model, dim_feedforward), jnp.float32) * s,
        "linear2_b": jax.random.normal(keys[11], (d_model,), jnp.float32) * s,
        "norm1_g": jnp.ones((d_model,), jnp.float32),
        "norm1_b": jnp.zeros((d_model,), jnp.float32),
        "norm2_g": jnp.ones((d_model,), jnp.float32),
        "norm2_b": jnp.zeros((d_model,), jnp.float32),
        "norm3_g": jnp.ones((d_model,), jnp.float32),
        "norm3_b": jnp.zeros((d_model,), jnp.float32),
    }


def prepare_params(p, d_model, compute_dtype=_COMPUTE_DTYPE):
    """One-time transform to kernel-ready layout: pre-transposed bf16 matmul weights,
    QK fused for self-attention, f32 biases / LayerNorm params as (1, dim) rows."""
    E = d_model
    wd = compute_dtype

    def split_in_proj(a):
        wq, wk, wv = a["in_w"][:E], a["in_w"][E:2 * E], a["in_w"][2 * E:]
        bq, bk, bv = a["in_b"][:E], a["in_b"][E:2 * E], a["in_b"][2 * E:]
        return wq, wk, wv, bq, bk, bv

    def prep_self(a):
        wq, wk, wv, bq, bk, bv = split_in_proj(a)
        return {
            "wqk": jnp.concatenate([wq.T, wk.T], axis=1).astype(wd),       # (E, 2E)
            "bqk": jnp.concatenate([bq, bk]).reshape(1, 2 * E).astype(jnp.float32),
            "wv": wv.T.astype(wd), "bv": bv.reshape(1, E).astype(jnp.float32),
            "wo": a["out_w"].T.astype(wd), "bo": a["out_b"].reshape(1, E).astype(jnp.float32),
        }

    def prep_cross(a):
        wq, wk, wv, bq, bk, bv = split_in_proj(a)
        return {
            "wq": wq.T.astype(wd), "bq": bq.reshape(1, E).astype(jnp.float32),
            "wk": wk.T.astype(wd), "bk": bk.reshape(1, E).astype(jnp.float32),
            "wv": wv.T.astype(wd), "bv": bv.reshape(1, E).astype(jnp.float32),
            "wo": a["out_w"].T.astype(wd), "bo": a["out_b"].reshape(1, E).astype(jnp.float32),
        }

    return {
        "self_attn": prep_self(p["self_attn"]),
        "multihead_attn": prep_cross(p["multihead_attn"]),
        "linear1_w": p["linear1_w"].T.astype(wd),
        "linear1_b": p["linear1_b"].reshape(1, -1).astype(jnp.float32),
        "linear2_w": p["linear2_w"].T.astype(wd),
        "linear2_b": p["linear2_b"].reshape(1, -1).astype(jnp.float32),
        "norm1_g": p["norm1_g"].reshape(1, E).astype(jnp.float32),
        "norm1_b": p["norm1_b"].reshape(1, E).astype(jnp.float32),
        "norm2_g": p["norm2_g"].reshape(1, E).astype(jnp.float32),
        "norm2_b": p["norm2_b"].reshape(1, E).astype(jnp.float32),
        "norm3_g": p["norm3_g"].reshape(1, E).astype(jnp.float32),
        "norm3_b": p["norm3_b"].reshape(1, E).astype(jnp.float32),
    }


if __name__ == "__main__":
    d_model, nhead, dim_feedforward = 32, 4, 64
    L_tgt, L_mem, batch = 8, 8, 2

    key = jax.random.PRNGKey(0)
    k_p, k_t, k_m, k_qp, k_pp = jax.random.split(key, 5)

    params = prepare_params(init_params(k_p, d_model, nhead, dim_feedforward), d_model)
    tgt = jax.random.normal(k_t, (L_tgt, batch, d_model), jnp.float32)
    memory = jax.random.normal(k_m, (L_mem, batch, d_model), jnp.float32)
    query_pos = jax.random.normal(k_qp, (L_tgt, batch, d_model), jnp.float32)
    pos = jax.random.normal(k_pp, (L_mem, batch, d_model), jnp.float32)

    fwd = jax.jit(functools.partial(transformer_decoder_layer, nhead=nhead))
    out, attn_full, attn_avg = fwd(tgt, memory, params, pos=pos, query_pos=query_pos)
    jax.block_until_ready((out, attn_full, attn_avg))

    assert out.shape == (L_tgt, batch, d_model)
    assert out.dtype == jnp.float32
    assert attn_full.shape == (batch, nhead, L_tgt, L_mem)
    assert attn_avg.shape == (batch, L_tgt, L_mem)
    print("KERNEL_OK")
</pallas_src>

<mosaic_0001>
module attributes {stable_mosaic.version = 11 : i64} {
  func.func @_attn_kernel(%arg0: i32, %arg1: memref<1x8x32xbf16, #tpu.memory_space<vmem>>, %arg2: memref<1x8x32xbf16, #tpu.memory_space<vmem>>, %arg3: memref<1x8x32xbf16, #tpu.memory_space<vmem>>, %arg4: memref<1x8x32xbf16, #tpu.memory_space<vmem>>) attributes {dimension_semantics = [#tpu.dimension_semantics<parallel>], iteration_bounds = array<i64: 2>, scalar_prefetch = 0 : i64, scratch_operands = 0 : i64, tpu.core_type = #tpu.core_type<tc>, window_params = [{transform_indices = @transform_0, window_bounds = array<i64: 1, 8, 32>}, {transform_indices = @transform_1, window_bounds = array<i64: 1, 8, 32>}, {transform_indices = @transform_2, window_bounds = array<i64: 1, 8, 32>}, {transform_indices = @transform_3, window_bounds = array<i64: 1, 8, 32>}]} {
    %c0 = arith.constant 0 : index
    %c0_0 = arith.constant 0 : index
    %c0_1 = arith.constant 0 : index
    %0 = vector.load %arg1[%c0, %c0_0, %c0_1] : memref<1x8x32xbf16, #tpu.memory_space<vmem>>, vector<1x8x32xbf16>
    %1 = vector.shape_cast %0 : vector<1x8x32xbf16> to vector<8x32xbf16>
    %c0_2 = arith.constant 0 : index
    %c0_3 = arith.constant 0 : index
    %c0_4 = arith.constant 0 : index
    %2 = vector.load %arg2[%c0_2, %c0_3, %c0_4] : memref<1x8x32xbf16, #tpu.memory_space<vmem>>, vector<1x8x32xbf16>
    %3 = vector.shape_cast %2 : vector<1x8x32xbf16> to vector<8x32xbf16>
    %c0_5 = arith.constant 0 : index
    %c0_6 = arith.constant 0 : index
    %c0_7 = arith.constant 0 : index
    %4 = vector.load %arg3[%c0_5, %c0_6, %c0_7] : memref<1x8x32xbf16, #tpu.memory_space<vmem>>, vector<1x8x32xbf16>
    %5 = vector.shape_cast %4 : vector<1x8x32xbf16> to vector<8x32xbf16>
    %6 = vector.extract_strided_slice %1 {offsets = [0, 0], sizes = [8, 8], strides = [1, 1]} : vector<8x32xbf16> to vector<8x8xbf16>
    %7 = vector.extract_strided_slice %3 {offsets = [0, 0], sizes = [8, 8], strides = [1, 1]} : vector<8x32xbf16> to vector<8x8xbf16>
    %cst = arith.constant dense<0.000000e+00> : vector<8x8xf32>
    %8 = tpu.matmul %6, %7, %cst {dimension_numbers = #tpu.dot_dimension_numbers<[1], [1], [0], [0], [0, 0, 1, 0], [], []>} : vector<8x8xbf16>, vector<8x8xbf16>, vector<8x8xf32> -> vector<8x8xf32>
    %cst_8 = arith.constant 0.353553385 : f32
    %9 = vector.broadcast %cst_8 : f32 to vector<8x8xf32>
    %10 = arith.mulf %8, %9 : vector<8x8xf32>
    %cst_9 = arith.constant dense<0xFF800000> : vector<8xf32>
    %11 = vector.multi_reduction <maximumf>, %10, %cst_9 [1] : vector<8x8xf32> to vector<8xf32>
    %12 = vector.shape_cast %11 : vector<8xf32> to vector<8x1xf32>
    %13 = vector.broadcast %12 : vector<8x1xf32> to vector<8x8xf32>
    %14 = arith.subf %10, %13 : vector<8x8xf32>
    %15 = math.exp %14 : vector<8x8xf32>
    %cst_10 = arith.constant dense<0.000000e+00> : vector<8xf32>
    %16 = vector.multi_reduction <add>, %15, %cst_10 [1] : vector<8x8xf32> to vector<8xf32>
    %17 = vector.shape_cast %16 : vector<8xf32> to vector<8x1xf32>
    %18 = tpu.reciprocal %17 {approx = true} : vector<8x1xf32> -> vector<8x1xf32>
    %19 = vector.broadcast %18 : vector<8x1xf32> to vector<8x8xf32>
    %20 = arith.mulf %15, %19 : vector<8x8xf32>
    %21 = arith.truncf %20 : vector<8x8xf32> to vector<8x8xbf16>
    %22 = vector.extract_strided_slice %5 {offsets = [0, 0], sizes = [8, 8], strides = [1, 1]} : vector<8x32xbf16> to vector<8x8xbf16>
    %cst_11 = arith.constant dense<0.000000e+00> : vector<8x8xf32>
    %23 = tpu.matmul %21, %22, %cst_11 {dimension_numbers = #tpu.dot_dimension_numbers<[1], [0], [0], [1], [0, 0, 1, 1], [], []>} : vector<8x8xbf16>, vector<8x8xbf16>, vector<8x8xf32> -> vector<8x8xf32>
    %24 = arith.truncf %23 : vector<8x8xf32> to vector<8x8xbf16>
    %c0_12 = arith.constant 0 : index
    %c0_13 = arith.constant 0 : index
    %c0_14 = arith.constant 0 : index
    %25 = vector.load %arg4[%c0_12, %c0_13, %c0_14] : memref<1x8x32xbf16, #tpu.memory_space<vmem>>, vector<1x8x8xbf16>
    %26 = vector.shape_cast %25 : vector<1x8x8xbf16> to vector<8x8xbf16>
    %27 = vector.shape_cast %24 : vector<8x8xbf16> to vector<1x8x8xbf16>
    tpu.vector_store %arg4[%c0_12, %c0_13, %c0_14], %27 {strides = array<i32>} : memref<1x8x32xbf16, #tpu.memory_space<vmem>>, vector<1x8x8xbf16>,
    %28 = vector.extract_strided_slice %1 {offsets = [0, 8], sizes = [8, 8], strides = [1, 1]} : vector<8x32xbf16> to vector<8x8xbf16>
    %29 = vector.extract_strided_slice %3 {offsets = [0, 8], sizes = [8, 8], strides = [1, 1]} : vector<8x32xbf16> to vector<8x8xbf16>
    %cst_15 = arith.constant dense<0.000000e+00> : vector<8x8xf32>
    %30 = tpu.matmul %28, %29, %cst_15 {dimension_numbers = #tpu.dot_dimension_numbers<[1], [1], [0], [0], [0, 0, 1, 0], [], []>} : vector<8x8xbf16>, vector<8x8xbf16>, vector<8x8xf32> -> vector<8x8xf32>
    %cst_16 = arith.constant 0.353553385 : f32
    %31 = vector.broadcast %cst_16 : f32 to vector<8x8xf32>
    %32 = arith.mulf %30, %31 : vector<8x8xf32>
    %cst_17 = arith.constant dense<0xFF800000> : vector<8xf32>
    %33 = vector.multi_reduction <maximumf>, %32, %cst_17 [1] : vector<8x8xf32> to vector<8xf32>
    %34 = vector.shape_cast %33 : vector<8xf32> to vector<8x1xf32>
    %35 = vector.broadcast %34 : vector<8x1xf32> to vector<8x8xf32>
    %36 = arith.subf %32, %35 : vector<8x8xf32>
    %37 = math.exp %36 : vector<8x8xf32>
    %cst_18 = arith.constant dense<0.000000e+00> : vector<8xf32>
    %38 = vector.multi_reduction <add>, %37, %cst_18 [1] : vector<8x8xf32> to vector<8xf32>
    %39 = vector.shape_cast %38 : vector<8xf32> to vector<8x1xf32>
    %40 = tpu.reciprocal %39 {approx = true} : vector<8x1xf32> -> vector<8x1xf32>
    %41 = vector.broadcast %40 : vector<8x1xf32> to vector<8x8xf32>
    %42 = arith.mulf %37, %41 : vector<8x8xf32>
    %43 = arith.truncf %42 : vector<8x8xf32> to vector<8x8xbf16>
    %44 = vector.extract_strided_slice %5 {offsets = [0, 8], sizes = [8, 8], strides = [1, 1]} : vector<8x32xbf16> to vector<8x8xbf16>
    %cst_19 = arith.constant dense<0.000000e+00> : vector<8x8xf32>
    %45 = tpu.matmul %43, %44, %cst_19 {dimension_numbers = #tpu.dot_dimension_numbers<[1], [0], [0], [1], [0, 0, 1, 1], [], []>} : vector<8x8xbf16>, vector<8x8xbf16>, vector<8x8xf32> -> vector<8x8xf32>
    %46 = arith.truncf %45 : vector<8x8xf32> to vector<8x8xbf16>
    %c0_20 = arith.constant 0 : index
    %c0_21 = arith.constant 0 : index
    %c8 = arith.constant 8 : index
    %47 = vector.load %arg4[%c0_20, %c0_21, %c8] : memref<1x8x32xbf16, #tpu.memory_space<vmem>>, vector<1x8x8xbf16>
    %48 = vector.shape_cast %47 : vector<1x8x8xbf16> to vector<8x8xbf16>
    %49 = vector.shape_cast %46 : vector<8x8xbf16> to vector<1x8x8xbf16>
    tpu.vector_store %arg4[%c0_20, %c0_21, %c8], %49 {strides = array<i32>} : memref<1x8x32xbf16, #tpu.memory_space<vmem>>, vector<1x8x8xbf16>,
    %50 = vector.extract_strided_slice %1 {offsets = [0, 16], sizes = [8, 8], strides = [1, 1]} : vector<8x32xbf16> to vector<8x8xbf16>
    %51 = vector.extract_strided_slice %3 {offsets = [0, 16], sizes = [8, 8], strides = [1, 1]} : vector<8x32xbf16> to vector<8x8xbf16>
    %cst_22 = arith.constant dense<0.000000e+00> : vector<8x8xf32>
    %52 = tpu.matmul %50, %51, %cst_22 {dimension_numbers = #tpu.dot_dimension_numbers<[1], [1], [0], [0], [0, 0, 1, 0], [], []>} : vector<8x8xbf16>, vector<8x8xbf16>, vector<8x8xf32> -> vector<8x8xf32>
    %cst_23 = arith.constant 0.353553385 : f32
    %53 = vector.broadcast %cst_23 : f32 to vector<8x8xf32>
    %54 = arith.mulf %52, %53 : vector<8x8xf32>
    %cst_24 = arith.constant dense<0xFF800000> : vector<8xf32>
    %55 = vector.multi_reduction <maximumf>, %54, %cst_24 [1] : vector<8x8xf32> to vector<8xf32>
    %56 = vector.shape_cast %55 : vector<8xf32> to vector<8x1xf32>
    %57 = vector.broadcast %56 : vector<8x1xf32> to vector<8x8xf32>
    %58 = arith.subf %54, %57 : vector<8x8xf32>
    %59 = math.exp %58 : vector<8x8xf32>
    %cst_25 = arith.constant dense<0.000000e+00> : vector<8xf32>
    %60 = vector.multi_reduction <add>, %59, %cst_25 [1] : vector<8x8xf32> to vector<8xf32>
    %61 = vector.shape_cast %60 : vector<8xf32> to vector<8x1xf32>
    %62 = tpu.reciprocal %61 {approx = true} : vector<8x1xf32> -> vector<8x1xf32>
    %63 = vector.broadcast %62 : vector<8x1xf32> to vector<8x8xf32>
    %64 = arith.mulf %59, %63 : vector<8x8xf32>
    %65 = arith.truncf %64 : vector<8x8xf32> to vector<8x8xbf16>
    %66 = vector.extract_strided_slice %5 {offsets = [0, 16], sizes = [8, 8], strides = [1, 1]} : vector<8x32xbf16> to vector<8x8xbf16>
    %cst_26 = arith.constant dense<0.000000e+00> : vector<8x8xf32>
    %67 = tpu.matmul %65, %66, %cst_26 {dimension_numbers = #tpu.dot_dimension_numbers<[1], [0], [0], [1], [0, 0, 1, 1], [], []>} : vector<8x8xbf16>, vector<8x8xbf16>, vector<8x8xf32> -> vector<8x8xf32>
    %68 = arith.truncf %67 : vector<8x8xf32> to vector<8x8xbf16>
    %c0_27 = arith.constant 0 : index
    %c0_28 = arith.constant 0 : index
    %c16 = arith.constant 16 : index
    %69 = vector.load %arg4[%c0_27, %c0_28, %c16] : memref<1x8x32xbf16, #tpu.memory_space<vmem>>, vector<1x8x8xbf16>
    %70 = vector.shape_cast %69 : vector<1x8x8xbf16> to vector<8x8xbf16>
    %71 = vector.shape_cast %68 : vector<8x8xbf16> to vector<1x8x8xbf16>
    tpu.vector_store %arg4[%c0_27, %c0_28, %c16], %71 {strides = array<i32>} : memref<1x8x32xbf16, #tpu.memory_space<vmem>>, vector<1x8x8xbf16>,
    %72 = vector.extract_strided_slice %1 {offsets = [0, 24], sizes = [8, 8], strides = [1, 1]} : vector<8x32xbf16> to vector<8x8xbf16>
    %73 = vector.extract_strided_slice %3 {offsets = [0, 24], sizes = [8, 8], strides = [1, 1]} : vector<8x32xbf16> to vector<8x8xbf16>
    %cst_29 = arith.constant dense<0.000000e+00> : vector<8x8xf32>
    %74 = tpu.matmul %72, %73, %cst_29 {dimension_numbers = #tpu.dot_dimension_numbers<[1], [1], [0], [0], [0, 0, 1, 0], [], []>} : vector<8x8xbf16>, vector<8x8xbf16>, vector<8x8xf32> -> vector<8x8xf32>
    %cst_30 = arith.constant 0.353553385 : f32
    %75 = vector.broadcast %cst_30 : f32 to vector<8x8xf32>
    %76 = arith.mulf %74, %75 : vector<8x8xf32>
    %cst_31 = arith.constant dense<0xFF800000> : vector<8xf32>
    %77 = vector.multi_reduction <maximumf>, %76, %cst_31 [1] : vector<8x8xf32> to vector<8xf32>
    %78 = vector.shape_cast %77 : vector<8xf32> to vector<8x1xf32>
    %79 = vector.broadcast %78 : vector<8x1xf32> to vector<8x8xf32>
    %80 = arith.subf %76, %79 : vector<8x8xf32>
    %81 = math.exp %80 : vector<8x8xf32>
    %cst_32 = arith.constant dense<0.000000e+00> : vector<8xf32>
    %82 = vector.multi_reduction <add>, %81, %cst_32 [1] : vector<8x8xf32> to vector<8xf32>
    %83 = vector.shape_cast %82 : vector<8xf32> to vector<8x1xf32>
    %84 = tpu.reciprocal %83 {approx = true} : vector<8x1xf32> -> vector<8x1xf32>
    %85 = vector.broadcast %84 : vector<8x1xf32> to vector<8x8xf32>
    %86 = arith.mulf %81, %85 : vector<8x8xf32>
    %87 = arith.truncf %86 : vector<8x8xf32> to vector<8x8xbf16>
    %88 = vector.extract_strided_slice %5 {offsets = [0, 24], sizes = [8, 8], strides = [1, 1]} : vector<8x32xbf16> to vector<8x8xbf16>
    %cst_33 = arith.constant dense<0.000000e+00> : vector<8x8xf32>
    %89 = tpu.matmul %87, %88, %cst_33 {dimension_numbers = #tpu.dot_dimension_numbers<[1], [0], [0], [1], [0, 0, 1, 1], [], []>} : vector<8x8xbf16>, vector<8x8xbf16>, vector<8x8xf32> -> vector<8x8xf32>
    %90 = arith.truncf %89 : vector<8x8xf32> to vector<8x8xbf16>
    %c0_34 = arith.constant 0 : index
    %c0_35 = arith.constant 0 : index
    %c24 = arith.constant 24 : index
    %91 = vector.load %arg4[%c0_34, %c0_35, %c24] : memref<1x8x32xbf16, #tpu.memory_space<vmem>>, vector<1x8x8xbf16>
    %92 = vector.shape_cast %91 : vector<1x8x8xbf16> to vector<8x8xbf16>
    %93 = vector.shape_cast %90 : vector<8x8xbf16> to vector<1x8x8xbf16>
    tpu.vector_store %arg4[%c0_34, %c0_35, %c24], %93 {strides = array<i32>} : memref<1x8x32xbf16, #tpu.memory_space<vmem>>, vector<1x8x8xbf16>,
    return
  }
  func.func @transform_0(%arg0: i32) -> (i32, i32, i32) {
    %c0_i32 = arith.constant 0 : i32
    %c0_i32_0 = arith.constant 0 : i32
    %c0_i32_1 = arith.constant 0 : i32
    return %arg0, %c0_i32, %c0_i32_0 : i32, i32, i32
  }
  func.func @transform_1(%arg0: i32) -> (i32, i32, i32) {
    %c0_i32 = arith.constant 0 : i32
    %c0_i32_0 = arith.constant 0 : i32
    %c0_i32_1 = arith.constant 0 : i32
    return %arg0, %c0_i32, %c0_i32_0 : i32, i32, i32
  }
  func.func @transform_2(%arg0: i32) -> (i32, i32, i32) {
    %c0_i32 = arith.constant 0 : i32
    %c0_i32_0 = arith.constant 0 : i32
    %c0_i32_1 = arith.constant 0 : i32
    return %arg0, %c0_i32, %c0_i32_0 : i32, i32, i32
  }
  func.func @transform_3(%arg0: i32) -> (i32, i32, i32) {
    %c0_i32 = arith.constant 0 : i32
    %c0_i32_0 = arith.constant 0 : i32
    %c0_i32_1 = arith.constant 0 : i32
    return %arg0, %c0_i32, %c0_i32_0 : i32, i32, i32
  }
}

module attributes {stable_mosaic.version = 11 : i64} {
  func.func @_self_qkv_kernel(%arg0: i32, %arg1: memref<16x32xf32, #tpu.memory_space<vmem>>, %arg2: memref<16x32xf32, #tpu.memory_space<vmem>>, %arg3: memref<32x64xbf16, #tpu.memory_space<vmem>>, %arg4: memref<1x64xf32, #tpu.memory_space<vmem>>, %arg5: memref<32x32xbf16, #tpu.memory_space<vmem>>, %arg6: memref<1x32xf32, #tpu.memory_space<vmem>>, %arg7: memref<16x32xbf16, #tpu.memory_space<vmem>>, %arg8: memref<16x32xbf16, #tpu.memory_space<vmem>>, %arg9: memref<16x32xbf16, #tpu.memory_space<vmem>>) attributes {dimension_semantics = [#tpu.dimension_semantics<parallel>], iteration_bounds = array<i64: 1>, scalar_prefetch = 0 : i64, scratch_operands = 0 : i64, tpu.core_type = #tpu.core_type<tc>, window_params = [{transform_indices = @transform_0, window_bounds = array<i64: 16, 32>}, {transform_indices = @transform_1, window_bounds = array<i64: 16, 32>}, {pipeline_mode = #tpu.pipeline_mode<synchronous>, transform_indices = @transform_2, window_bounds = array<i64: 32, 64>}, {pipeline_mode = #tpu.pipeline_mode<synchronous>, transform_indices = @transform_3, window_bounds = array<i64: 1, 64>}, {pipeline_mode = #tpu.pipeline_mode<synchronous>, transform_indices = @transform_4, window_bounds = array<i64: 32, 32>}, {pipeline_mode = #tpu.pipeline_mode<synchronous>, transform_indices = @transform_5, window_bounds = array<i64: 1, 32>}, {transform_indices = @transform_6, window_bounds = array<i64: 16, 32>}, {transform_indices = @transform_7, window_bounds = array<i64: 16, 32>}, {transform_indices = @transform_8, window_bounds = array<i64: 16, 32>}]} {
    %c0 = arith.constant 0 : index
    %c0_0 = arith.constant 0 : index
    %0 = vector.load %arg1[%c0, %c0_0] : memref<16x32xf32, #tpu.memory_space<vmem>>, vector<16x32xf32>
    %c0_1 = arith.constant 0 : index
    %c0_2 = arith.constant 0 : index
    %1 = vector.load %arg2[%c0_1, %c0_2] : memref<16x32xf32, #tpu.memory_space<vmem>>, vector<16x32xf32>
    %2 = arith.addf %0, %1 : vector<16x32xf32>
    %3 = arith.truncf %2 : vector<16x32xf32> to vector<16x32xbf16>
    %c0_3 = arith.constant 0 : index
    %c0_4 = arith.constant 0 : index
    %4 = vector.load %arg3[%c0_3, %c0_4] : memref<32x64xbf16, #tpu.memory_space<vmem>>, vector<32x64xbf16>
    %cst = arith.constant dense<0.000000e+00> : vector<16x64xf32>
    %5 = tpu.matmul %3, %4, %cst {dimension_numbers = #tpu.dot_dimension_numbers<[1], [0], [0], [1], [0, 0, 1, 1], [], []>} : vector<16x32xbf16>, vector<32x64xbf16>, vector<16x64xf32> -> vector<16x64xf32>
    %c0_5 = arith.constant 0 : index
    %c0_6 = arith.constant 0 : index
    %6 = vector.load %arg4[%c0_5, %c0_6] : memref<1x64xf32, #tpu.memory_space<vmem>>, vector<1x64xf32>
    %7 = vector.broadcast %6 : vector<1x64xf32> to vector<16x64xf32>
    %8 = arith.addf %5, %7 : vector<16x64xf32>
    %9 = vector.extract_strided_slice %8 {offsets = [0, 0], sizes = [16, 32], strides = [1, 1]} : vector<16x64xf32> to vector<16x32xf32>
    %10 = arith.truncf %9 : vector<16x32xf32> to vector<16x32xbf16>
    %c0_7 = arith.constant 0 : index
    %c0_8 = arith.constant 0 : index
    %11 = vector.load %arg7[%c0_7, %c0_8] : memref<16x32xbf16, #tpu.memory_space<vmem>>, vector<16x32xbf16>
    tpu.vector_store %arg7[%c0_7, %c0_8], %10 {strides = array<i32>} : memref<16x32xbf16, #tpu.memory_space<vmem>>, vector<16x32xbf16>,
    %12 = vector.extract_strided_slice %8 {offsets = [0, 32], sizes = [16, 32], strides = [1, 1]} : vector<16x64xf32> to vector<16x32xf32>
    %13 = arith.truncf %12 : vector<16x32xf32> to vector<16x32xbf16>
    %c0_9 = arith.constant 0 : index
    %c0_10 = arith.constant 0 : index
    %14 = vector.load %arg8[%c0_9, %c0_10] : memref<16x32xbf16, #tpu.memory_space<vmem>>, vector<16x32xbf16>
    tpu.vector_store %arg8[%c0_9, %c0_10], %13 {strides = array<i32>} : memref<16x32xbf16, #tpu.memory_space<vmem>>, vector<16x32xbf16>,
    %c0_11 = arith.constant 0 : index
    %c0_12 = arith.constant 0 : index
    %15 = vector.load %arg1[%c0_11, %c0_12] : memref<16x32xf32, #tpu.memory_space<vmem>>, vector<16x32xf32>
    %16 = arith.truncf %15 : vector<16x32xf32> to vector<16x32xbf16>
    %c0_13 = arith.constant 0 : index
    %c0_14 = arith.constant 0 : index
    %17 = vector.load %arg5[%c0_13, %c0_14] : memref<32x32xbf16, #tpu.memory_space<vmem>>, vector<32x32xbf16>
    %cst_15 = arith.constant dense<0.000000e+00> : vector<16x32xf32>
    %18 = tpu.matmul %16, %17, %cst_15 {dimension_numbers = #tpu.dot_dimension_numbers<[1], [0], [0], [1], [0, 0, 1, 1], [], []>} : vector<16x32xbf16>, vector<32x32xbf16>, vector<16x32xf32> -> vector<16x32xf32>
    %c0_16 = arith.constant 0 : index
    %c0_17 = arith.constant 0 : index
    %19 = vector.load %arg6[%c0_16, %c0_17] : memref<1x32xf32, #tpu.memory_space<vmem>>, vector<1x32xf32>
    %20 = vector.broadcast %19 : vector<1x32xf32> to vector<16x32xf32>
    %21 = arith.addf %18, %20 : vector<16x32xf32>
    %22 = arith.truncf %21 : vector<16x32xf32> to vector<16x32xbf16>
    %c0_18 = arith.constant 0 : index
    %c0_19 = arith.constant 0 : index
    %23 = vector.load %arg9[%c0_18, %c0_19] : memref<16x32xbf16, #tpu.memory_space<vmem>>, vector<16x32xbf16>
    tpu.vector_store %arg9[%c0_18, %c0_19], %22 {strides = array<i32>} : memref<16x32xbf16, #tpu.memory_space<vmem>>, vector<16x32xbf16>,
    return
  }
  func.func @transform_0(%arg0: i32) -> (i32, i32) {
    %c0_i32 = arith.constant 0 : i32
    %c0_i32_0 = arith.constant 0 : i32
    return %arg0, %c0_i32 : i32, i32
  }
  func.func @transform_1(%arg0: i32) -> (i32, i32) {
    %c0_i32 = arith.constant 0 : i32
    %c0_i32_0 = arith.constant 0 : i32
    return %arg0, %c0_i32 : i32, i32
  }
  func.func @transform_2(%arg0: i32) -> (i32, i32) {
    %c0_i32 = arith.constant 0 : i32
    %c0_i32_0 = arith.constant 0 : i32
    %c0_i32_1 = arith.constant 0 : i32
    return %c0_i32, %c0_i32_0 : i32, i32
  }
  func.func @transform_3(%arg0: i32) -> (i32, i32) {
    %c0_i32 = arith.constant 0 : i32
    %c0_i32_0 = arith.constant 0 : i32
    %c0_i32_1 = arith.constant 0 : i32
    return %c0_i32, %c0_i32_0 : i32, i32
  }
  func.func @transform_4(%arg0: i32) -> (i32, i32) {
    %c0_i32 = arith.constant 0 : i32
    %c0_i32_0 = arith.constant 0 : i32
    %c0_i32_1 = arith.constant 0 : i32
    return %c0_i32, %c0_i32_0 : i32, i32
  }
  func.func @transform_5(%arg0: i32) -> (i32, i32) {
    %c0_i32 = arith.constant 0 : i32
    %c0_i32_0 = arith.constant 0 : i32
    %c0_i32_1 = arith.constant 0 : i32
    return %c0_i32, %c0_i32_0 : i32, i32
  }
  func.func @transform_6(%arg0: i32) -> (i32, i32) {
    %c0_i32 = arith.constant 0 : i32
    %c0_i32_0 = arith.constant 0 : i32
    return %arg0, %c0_i32 : i32, i32
  }
  func.func @transform_7(%arg0: i32) -> (i32, i32) {
    %c0_i32 = arith.constant 0 : i32
    %c0_i32_0 = arith.constant 0 : i32
    return %arg0, %c0_i32 : i32, i32
  }
  func.func @transform_8(%arg0: i32) -> (i32, i32) {
    %c0_i32 = arith.constant 0 : i32
    %c0_i32_0 = arith.constant 0 : i32
    return %arg0, %c0_i32 : i32, i32
  }
}

module attributes {stable_mosaic.version = 11 : i64} {
  func.func @_cross_kv_kernel(%arg0: i32, %arg1: memref<16x32xf32, #tpu.memory_space<vmem>>, %arg2: memref<16x32xf32, #tpu.memory_space<vmem>>, %arg3: memref<32x32xbf16, #tpu.memory_space<vmem>>, %arg4: memref<1x32xf32, #tpu.memory_space<vmem>>, %arg5: memref<32x32xbf16, #tpu.memory_space<vmem>>, %arg6: memref<1x32xf32, #tpu.memory_space<vmem>>, %arg7: memref<16x32xbf16, #tpu.memory_space<vmem>>, %arg8: memref<16x32xbf16, #tpu.memory_space<vmem>>) attributes {dimension_semantics = [#tpu.dimension_semantics<parallel>], iteration_bounds = array<i64: 1>, scalar_prefetch = 0 : i64, scratch_operands = 0 : i64, tpu.core_type = #tpu.core_type<tc>, window_params = [{transform_indices = @transform_0, window_bounds = array<i64: 16, 32>}, {transform_indices = @transform_1, window_bounds = array<i64: 16, 32>}, {pipeline_mode = #tpu.pipeline_mode<synchronous>, transform_indices = @transform_2, window_bounds = array<i64: 32, 32>}, {pipeline_mode = #tpu.pipeline_mode<synchronous>, transform_indices = @transform_3, window_bounds = array<i64: 1, 32>}, {pipeline_mode = #tpu.pipeline_mode<synchronous>, transform_indices = @transform_4, window_bounds = array<i64: 32, 32>}, {pipeline_mode = #tpu.pipeline_mode<synchronous>, transform_indices = @transform_5, window_bounds = array<i64: 1, 32>}, {transform_indices = @transform_6, window_bounds = array<i64: 16, 32>}, {transform_indices = @transform_7, window_bounds = array<i64: 16, 32>}]} {
    %c0 = arith.constant 0 : index
    %c0_0 = arith.constant 0 : index
    %0 = vector.load %arg1[%c0, %c0_0] : memref<16x32xf32, #tpu.memory_space<vmem>>, vector<16x32xf32>
    %c0_1 = arith.constant 0 : index
    %c0_2 = arith.constant 0 : index
    %1 = vector.load %arg2[%c0_1, %c0_2] : memref<16x32xf32, #tpu.memory_space<vmem>>, vector<16x32xf32>
    %2 = arith.addf %0, %1 : vector<16x32xf32>
    %3 = arith.truncf %2 : vector<16x32xf32> to vector<16x32xbf16>
    %c0_3 = arith.constant 0 : index
    %c0_4 = arith.constant 0 : index
    %4 = vector.load %arg3[%c0_3, %c0_4] : memref<32x32xbf16, #tpu.memory_space<vmem>>, vector<32x32xbf16>
    %cst = arith.constant dense<0.000000e+00> : vector<16x32xf32>
    %5 = tpu.matmul %3, %4, %cst {dimension_numbers = #tpu.dot_dimension_numbers<[1], [0], [0], [1], [0, 0, 1, 1], [], []>} : vector<16x32xbf16>, vector<32x32xbf16>, vector<16x32xf32> -> vector<16x32xf32>
    %c0_5 = arith.constant 0 : index
    %c0_6 = arith.constant 0 : index
    %6 = vector.load %arg4[%c0_5, %c0_6] : memref<1x32xf32, #tpu.memory_space<vmem>>, vector<1x32xf32>
    %7 = vector.broadcast %6 : vector<1x32xf32> to vector<16x32xf32>
    %8 = arith.addf %5, %7 : vector<16x32xf32>
    %9 = arith.truncf %8 : vector<16x32xf32> to vector<16x32xbf16>
    %c0_7 = arith.constant 0 : index
    %c0_8 = arith.constant 0 : index
    %10 = vector.load %arg7[%c0_7, %c0_8] : memref<16x32xbf16, #tpu.memory_space<vmem>>, vector<16x32xbf16>
    tpu.vector_store %arg7[%c0_7, %c0_8], %9 {strides = array<i32>} : memref<16x32xbf16, #tpu.memory_space<vmem>>, vector<16x32xbf16>,
    %c0_9 = arith.constant 0 : index
    %c0_10 = arith.constant 0 : index
    %11 = vector.load %arg1[%c0_9, %c0_10] : memref<16x32xf32, #tpu.memory_space<vmem>>, vector<16x32xf32>
    %12 = arith.truncf %11 : vector<16x32xf32> to vector<16x32xbf16>
    %c0_11 = arith.constant 0 : index
    %c0_12 = arith.constant 0 : index
    %13 = vector.load %arg5[%c0_11, %c0_12] : memref<32x32xbf16, #tpu.memory_space<vmem>>, vector<32x32xbf16>
    %cst_13 = arith.constant dense<0.000000e+00> : vector<16x32xf32>
    %14 = tpu.matmul %12, %13, %cst_13 {dimension_numbers = #tpu.dot_dimension_numbers<[1], [0], [0], [1], [0, 0, 1, 1], [], []>} : vector<16x32xbf16>, vector<32x32xbf16>, vector<16x32xf32> -> vector<16x32xf32>
    %c0_14 = arith.constant 0 : index
    %c0_15 = arith.constant 0 : index
    %15 = vector.load %arg6[%c0_14, %c0_15] : memref<1x32xf32, #tpu.memory_space<vmem>>, vector<1x32xf32>
    %16 = vector.broadcast %15 : vector<1x32xf32> to vector<16x32xf32>
    %17 = arith.addf %14, %16 : vector<16x32xf32>
    %18 = arith.truncf %17 : vector<16x32xf32> to vector<16x32xbf16>
    %c0_16 = arith.constant 0 : index
    %c0_17 = arith.constant 0 : index
    %19 = vector.load %arg8[%c0_16, %c0_17] : memref<16x32xbf16, #tpu.memory_space<vmem>>, vector<16x32xbf16>
    tpu.vector_store %arg8[%c0_16, %c0_17], %18 {strides = array<i32>} : memref<16x32xbf16, #tpu.memory_space<vmem>>, vector<16x32xbf16>,
    return
  }
  func.func @transform_0(%arg0: i32) -> (i32, i32) {
    %c0_i32 = arith.constant 0 : i32
    %c0_i32_0 = arith.constant 0 : i32
    return %arg0, %c0_i32 : i32, i32
  }
  func.func @transform_1(%arg0: i32) -> (i32, i32) {
    %c0_i32 = arith.constant 0 : i32
    %c0_i32_0 = arith.constant 0 : i32
    return %arg0, %c0_i32 : i32, i32
  }
  func.func @transform_2(%arg0: i32) -> (i32, i32) {
    %c0_i32 = arith.constant 0 : i32
    %c0_i32_0 = arith.constant 0 : i32
    %c0_i32_1 = arith.constant 0 : i32
    return %c0_i32, %c0_i32_0 : i32, i32
  }
  func.func @transform_3(%arg0: i32) -> (i32, i32) {
    %c0_i32 = arith.constant 0 : i32
    %c0_i32_0 = arith.constant 0 : i32
    %c0_i32_1 = arith.constant 0 : i32
    return %c0_i32, %c0_i32_0 : i32, i32
  }
  func.func @transform_4(%arg0: i32) -> (i32, i32) {
    %c0_i32 = arith.constant 0 : i32
    %c0_i32_0 = arith.constant 0 : i32
    %c0_i32_1 = arith.constant 0 : i32
    return %c0_i32, %c0_i32_0 : i32, i32
  }
  func.func @transform_5(%arg0: i32) -> (i32, i32) {
    %c0_i32 = arith.constant 0 : i32
    %c0_i32_0 = arith.constant 0 : i32
    %c0_i32_1 = arith.constant 0 : i32
    return %c0_i32, %c0_i32_0 : i32, i32
  }
  func.func @transform_6(%arg0: i32) -> (i32, i32) {
    %c0_i32 = arith.constant 0 : i32
    %c0_i32_0 = arith.constant 0 : i32
    return %arg0, %c0_i32 : i32, i32
  }
  func.func @transform_7(%arg0: i32) -> (i32, i32) {
    %c0_i32 = arith.constant 0 : i32
    %c0_i32_0 = arith.constant 0 : i32
    return %arg0, %c0_i32 : i32, i32
  }
}

module attributes {stable_mosaic.version = 11 : i64} {
  func.func @_proj_ln_kernel(%arg0: i32, %arg1: memref<16x32xbf16, #tpu.memory_space<vmem>>, %arg2: memref<16x32xf32, #tpu.memory_space<vmem>>, %arg3: memref<32x32xbf16, #tpu.memory_space<vmem>>, %arg4: memref<1x32xf32, #tpu.memory_space<vmem>>, %arg5: memref<1x32xf32, #tpu.memory_space<vmem>>, %arg6: memref<1x32xf32, #tpu.memory_space<vmem>>, %arg7: memref<16x32xf32, #tpu.memory_space<vmem>>, %arg8: memref<32x32xbf16, #tpu.memory_space<vmem>>, %arg9: memref<1x32xf32, #tpu.memory_space<vmem>>, %arg10: memref<16x32xbf16, #tpu.memory_space<vmem>>, %arg11: memref<16x32xbf16, #tpu.memory_space<vmem>>) attributes {dimension_semantics = [#tpu.dimension_semantics<parallel>], iteration_bounds = array<i64: 1>, scalar_prefetch = 0 : i64, scratch_operands = 0 : i64, tpu.core_type = #tpu.core_type<tc>, window_params = [{transform_indices = @transform_0, window_bounds = array<i64: 16, 32>}, {transform_indices = @transform_1, window_bounds = array<i64: 16, 32>}, {pipeline_mode = #tpu.pipeline_mode<synchronous>, transform_indices = @transform_2, window_bounds = array<i64: 32, 32>}, {pipeline_mode = #tpu.pipeline_mode<synchronous>, transform_indices = @transform_3, window_bounds = array<i64: 1, 32>}, {pipeline_mode = #tpu.pipeline_mode<synchronous>, transform_indices = @transform_4, window_bounds = array<i64: 1, 32>}, {pipeline_mode = #tpu.pipeline_mode<synchronous>, transform_indices = @transform_5, window_bounds = array<i64: 1, 32>}, {transform_indices = @transform_6, window_bounds = array<i64: 16, 32>}, {pipeline_mode = #tpu.pipeline_mode<synchronous>, transform_indices = @transform_7, window_bounds = array<i64: 32, 32>}, {pipeline_mode = #tpu.pipeline_mode<synchronous>, transform_indices = @transform_8, window_bounds = array<i64: 1, 32>}, {transform_indices = @transform_9, window_bounds = array<i64: 16, 32>}, {transform_indices = @transform_10, window_bounds = array<i64: 16, 32>}]} {
    %c0 = arith.constant 0 : index
    %c0_0 = arith.constant 0 : index
    %0 = vector.load %arg1[%c0, %c0_0] : memref<16x32xbf16, #tpu.memory_space<vmem>>, vector<16x32xbf16>
    %c0_1 = arith.constant 0 : index
    %c0_2 = arith.constant 0 : index
    %1 = vector.load %arg3[%c0_1, %c0_2] : memref<32x32xbf16, #tpu.memory_space<vmem>>, vector<32x32xbf16>
    %cst = arith.constant dense<0.000000e+00> : vector<16x32xf32>
    %2 = tpu.matmul %0, %1, %cst {dimension_numbers = #tpu.dot_dimension_numbers<[1], [0], [0], [1], [0, 0, 1, 1], [], []>} : vector<16x32xbf16>, vector<32x32xbf16>, vector<16x32xf32> -> vector<16x32xf32>
    %c0_3 = arith.constant 0 : index
    %c0_4 = arith.constant 0 : index
    %3 = vector.load %arg4[%c0_3, %c0_4] : memref<1x32xf32, #tpu.memory_space<vmem>>, vector<1x32xf32>
    %4 = vector.broadcast %3 : vector<1x32xf32> to vector<16x32xf32>
    %5 = arith.addf %2, %4 : vector<16x32xf32>
    %c0_5 = arith.constant 0 : index
    %c0_6 = arith.constant 0 : index
    %6 = vector.load %arg2[%c0_5, %c0_6] : memref<16x32xf32, #tpu.memory_space<vmem>>, vector<16x32xf32>
    %7 = arith.addf %5, %6 : vector<16x32xf32>
    %cst_7 = arith.constant dense<0.000000e+00> : vector<16xf32>
    %8 = vector.multi_reduction <add>, %7, %cst_7 [1] : vector<16x32xf32> to vector<16xf32>
    %9 = vector.shape_cast %8 : vector<16xf32> to vector<16x1xf32>
    %cst_8 = arith.constant 3.200000e+01 : f32
    %10 = vector.broadcast %cst_8 : f32 to vector<16x1xf32>
    %11 = arith.divf %9, %10 : vector<16x1xf32>
    %12 = vector.broadcast %11 : vector<16x1xf32> to vector<16x32xf32>
    %13 = arith.subf %7, %12 : vector<16x32xf32>
    %14 = arith.mulf %13, %13 : vector<16x32xf32>
    %cst_9 = arith.constant dense<0.000000e+00> : vector<16xf32>
    %15 = vector.multi_reduction <add>, %14, %cst_9 [1] : vector<16x32xf32> to vector<16xf32>
    %16 = vector.shape_cast %15 : vector<16xf32> to vector<16x1xf32>
    %cst_10 = arith.constant 3.200000e+01 : f32
    %17 = vector.broadcast %cst_10 : f32 to vector<16x1xf32>
    %18 = arith.divf %16, %17 : vector<16x1xf32>
    %19 = vector.broadcast %11 : vector<16x1xf32> to vector<16x32xf32>
    %20 = arith.subf %7, %19 : vector<16x32xf32>
    %cst_11 = arith.constant 9.99999974E-6 : f32
    %21 = vector.broadcast %cst_11 : f32 to vector<16x1xf32>
    %22 = arith.addf %18, %21 : vector<16x1xf32>
    %23 = math.rsqrt %22 : vector<16x1xf32>
    %24 = vector.broadcast %23 : vector<16x1xf32> to vector<16x32xf32>
    %25 = arith.mulf %20, %24 : vector<16x32xf32>
    %c0_12 = arith.constant 0 : index
    %c0_13 = arith.constant 0 : index
    %26 = vector.load %arg5[%c0_12, %c0_13] : memref<1x32xf32, #tpu.memory_space<vmem>>, vector<1x32xf32>
    %27 = vector.broadcast %26 : vector<1x32xf32> to vector<16x32xf32>
    %28 = arith.mulf %25, %27 : vector<16x32xf32>
    %c0_14 = arith.constant 0 : index
    %c0_15 = arith.constant 0 : index
    %29 = vector.load %arg6[%c0_14, %c0_15] : memref<1x32xf32, #tpu.memory_space<vmem>>, vector<1x32xf32>
    %30 = vector.broadcast %29 : vector<1x32xf32> to vector<16x32xf32>
    %31 = arith.addf %28, %30 : vector<16x32xf32>
    %32 = arith.truncf %31 : vector<16x32xf32> to vector<16x32xbf16>
    %c0_16 = arith.constant 0 : index
    %c0_17 = arith.constant 0 : index
    %33 = vector.load %arg10[%c0_16, %c0_17] : memref<16x32xbf16, #tpu.memory_space<vmem>>, vector<16x32xbf16>
    tpu.vector_store %arg10[%c0_16, %c0_17], %32 {strides = array<i32>} : memref<16x32xbf16, #tpu.memory_space<vmem>>, vector<16x32xbf16>,
    %c0_18 = arith.constant 0 : index
    %c0_19 = arith.constant 0 : index
    %34 = vector.load %arg7[%c0_18, %c0_19] : memref<16x32xf32, #tpu.memory_space<vmem>>, vector<16x32xf32>
    %35 = arith.addf %31, %34 : vector<16x32xf32>
    %36 = arith.truncf %35 : vector<16x32xf32> to vector<16x32xbf16>
    %c0_20 = arith.constant 0 : index
    %c0_21 = arith.constant 0 : index
    %37 = vector.load %arg8[%c0_20, %c0_21] : memref<32x32xbf16, #tpu.memory_space<vmem>>, vector<32x32xbf16>
    %cst_22 = arith.constant dense<0.000000e+00> : vector<16x32xf32>
    %38 = tpu.matmul %36, %37, %cst_22 {dimension_numbers = #tpu.dot_dimension_numbers<[1], [0], [0], [1], [0, 0, 1, 1], [], []>} : vector<16x32xbf16>, vector<32x32xbf16>, vector<16x32xf32> -> vector<16x32xf32>
    %c0_23 = arith.constant 0 : index
    %c0_24 = arith.constant 0 : index
    %39 = vector.load %arg9[%c0_23, %c0_24] : memref<1x32xf32, #tpu.memory_space<vmem>>, vector<1x32xf32>
    %40 = vector.broadcast %39 : vector<1x32xf32> to vector<16x32xf32>
    %41 = arith.addf %38, %40 : vector<16x32xf32>
    %42 = arith.truncf %41 : vector<16x32xf32> to vector<16x32xbf16>
    %c0_25 = arith.constant 0 : index
    %c0_26 = arith.constant 0 : index
    %43 = vector.load %arg11[%c0_25, %c0_26] : memref<16x32xbf16, #tpu.memory_space<vmem>>, vector<16x32xbf16>
    tpu.vector_store %arg11[%c0_25, %c0_26], %42 {strides = array<i32>} : memref<16x32xbf16, #tpu.memory_space<vmem>>, vector<16x32xbf16>,
    return
  }
  func.func @transform_0(%arg0: i32) -> (i32, i32) {
    %c0_i32 = arith.constant 0 : i32
    %c0_i32_0 = arith.constant 0 : i32
    return %arg0, %c0_i32 : i32, i32
  }
  func.func @transform_1(%arg0: i32) -> (i32, i32) {
    %c0_i32 = arith.constant 0 : i32
    %c0_i32_0 = arith.constant 0 : i32
    return %arg0, %c0_i32 : i32, i32
  }
  func.func @transform_2(%arg0: i32) -> (i32, i32) {
    %c0_i32 = arith.constant 0 : i32
    %c0_i32_0 = arith.constant 0 : i32
    %c0_i32_1 = arith.constant 0 : i32
    return %c0_i32, %c0_i32_0 : i32, i32
  }
  func.func @transform_3(%arg0: i32) -> (i32, i32) {
    %c0_i32 = arith.constant 0 : i32
    %c0_i32_0 = arith.constant 0 : i32
    %c0_i32_1 = arith.constant 0 : i32
    return %c0_i32, %c0_i32_0 : i32, i32
  }
  func.func @transform_4(%arg0: i32) -> (i32, i32) {
    %c0_i32 = arith.constant 0 : i32
    %c0_i32_0 = arith.constant 0 : i32
    %c0_i32_1 = arith.constant 0 : i32
    return %c0_i32, %c0_i32_0 : i32, i32
  }
  func.func @transform_5(%arg0: i32) -> (i32, i32) {
    %c0_i32 = arith.constant 0 : i32
    %c0_i32_0 = arith.constant 0 : i32
    %c0_i32_1 = arith.constant 0 : i32
    return %c0_i32, %c0_i32_0 : i32, i32
  }
  func.func @transform_6(%arg0: i32) -> (i32, i32) {
    %c0_i32 = arith.constant 0 : i32
    %c0_i32_0 = arith.constant 0 : i32
    return %arg0, %c0_i32 : i32, i32
  }
  func.func @transform_7(%arg0: i32) -> (i32, i32) {
    %c0_i32 = arith.constant 0 : i32
    %c0_i32_0 = arith.constant 0 : i32
    %c0_i32_1 = arith.constant 0 : i32
    return %c0_i32, %c0_i32_0 : i32, i32
  }
  func.func @transform_8(%arg0: i32) -> (i32, i32) {
    %c0_i32 = arith.constant 0 : i32
    %c0_i32_0 = arith.constant 0 : i32
    %c0_i32_1 = arith.constant 0 : i32
    return %c0_i32, %c0_i32_0 : i32, i32
  }
  func.func @transform_9(%arg0: i32) -> (i32, i32) {
    %c0_i32 = arith.constant 0 : i32
    %c0_i32_0 = arith.constant 0 : i32
    return %arg0, %c0_i32 : i32, i32
  }
  func.func @transform_10(%arg0: i32) -> (i32, i32) {
    %c0_i32 = arith.constant 0 : i32
    %c0_i32_0 = arith.constant 0 : i32
    return %arg0, %c0_i32 : i32, i32
  }
}

module attributes {stable_mosaic.version = 11 : i64} {
  func.func @_attn_kernel(%arg0: i32, %arg1: memref<1x8x32xbf16, #tpu.memory_space<vmem>>, %arg2: memref<1x8x32xbf16, #tpu.memory_space<vmem>>, %arg3: memref<1x8x32xbf16, #tpu.memory_space<vmem>>, %arg4: memref<1x8x32xbf16, #tpu.memory_space<vmem>>, %arg5: memref<1x4x8x8xf32, #tpu.memory_space<vmem>>, %arg6: memref<1x8x8xf32, #tpu.memory_space<vmem>>) attributes {dimension_semantics = [#tpu.dimension_semantics<parallel>], iteration_bounds = array<i64: 2>, scalar_prefetch = 0 : i64, scratch_operands = 0 : i64, tpu.core_type = #tpu.core_type<tc>, window_params = [{transform_indices = @transform_0, window_bounds = array<i64: 1, 8, 32>}, {transform_indices = @transform_1, window_bounds = array<i64: 1, 8, 32>}, {transform_indices = @transform_2, window_bounds = array<i64: 1, 8, 32>}, {transform_indices = @transform_3, window_bounds = array<i64: 1, 8, 32>}, {transform_indices = @transform_4, window_bounds = array<i64: 1, 4, 8, 8>}, {transform_indices = @transform_5, window_bounds = array<i64: 1, 8, 8>}]} {
    %c0 = arith.constant 0 : index
    %c0_0 = arith.constant 0 : index
    %c0_1 = arith.constant 0 : index
    %0 = vector.load %arg1[%c0, %c0_0, %c0_1] : memref<1x8x32xbf16, #tpu.memory_space<vmem>>, vector<1x8x32xbf16>
    %1 = vector.shape_cast %0 : vector<1x8x32xbf16> to vector<8x32xbf16>
    %c0_2 = arith.constant 0 : index
    %c0_3 = arith.constant 0 : index
    %c0_4 = arith.constant 0 : index
    %2 = vector.load %arg2[%c0_2, %c0_3, %c0_4] : memref<1x8x32xbf16, #tpu.memory_space<vmem>>, vector<1x8x32xbf16>
    %3 = vector.shape_cast %2 : vector<1x8x32xbf16> to vector<8x32xbf16>
    %c0_5 = arith.constant 0 : index
    %c0_6 = arith.constant 0 : index
    %c0_7 = arith.constant 0 : index
    %4 = vector.load %arg3[%c0_5, %c0_6, %c0_7] : memref<1x8x32xbf16, #tpu.memory_space<vmem>>, vector<1x8x32xbf16>
    %5 = vector.shape_cast %4 : vector<1x8x32xbf16> to vector<8x32xbf16>
    %6 = vector.extract_strided_slice %1 {offsets = [0, 0], sizes = [8, 8], strides = [1, 1]} : vector<8x32xbf16> to vector<8x8xbf16>
    %7 = vector.extract_strided_slice %3 {offsets = [0, 0], sizes = [8, 8], strides = [1, 1]} : vector<8x32xbf16> to vector<8x8xbf16>
    %cst = arith.constant dense<0.000000e+00> : vector<8x8xf32>
    %8 = tpu.matmul %6, %7, %cst {dimension_numbers = #tpu.dot_dimension_numbers<[1], [1], [0], [0], [0, 0, 1, 0], [], []>} : vector<8x8xbf16>, vector<8x8xbf16>, vector<8x8xf32> -> vector<8x8xf32>
    %cst_8 = arith.constant 0.353553385 : f32
    %9 = vector.broadcast %cst_8 : f32 to vector<8x8xf32>
    %10 = arith.mulf %8, %9 : vector<8x8xf32>
    %cst_9 = arith.constant dense<0xFF800000> : vector<8xf32>
    %11 = vector.multi_reduction <maximumf>, %10, %cst_9 [1] : vector<8x8xf32> to vector<8xf32>
    %12 = vector.shape_cast %11 : vector<8xf32> to vector<8x1xf32>
    %13 = vector.broadcast %12 : vector<8x1xf32> to vector<8x8xf32>
    %14 = arith.subf %10, %13 : vector<8x8xf32>
    %15 = math.exp %14 : vector<8x8xf32>
    %cst_10 = arith.constant dense<0.000000e+00> : vector<8xf32>
    %16 = vector.multi_reduction <add>, %15, %cst_10 [1] : vector<8x8xf32> to vector<8xf32>
    %17 = vector.shape_cast %16 : vector<8xf32> to vector<8x1xf32>
    %18 = tpu.reciprocal %17 {approx = true} : vector<8x1xf32> -> vector<8x1xf32>
    %19 = vector.broadcast %18 : vector<8x1xf32> to vector<8x8xf32>
    %20 = arith.mulf %15, %19 : vector<8x8xf32>
    %21 = arith.truncf %20 : vector<8x8xf32> to vector<8x8xbf16>
    %22 = vector.extract_strided_slice %5 {offsets = [0, 0], sizes = [8, 8], strides = [1, 1]} : vector<8x32xbf16> to vector<8x8xbf16>
    %cst_11 = arith.constant dense<0.000000e+00> : vector<8x8xf32>
    %23 = tpu.matmul %21, %22, %cst_11 {dimension_numbers = #tpu.dot_dimension_numbers<[1], [0], [0], [1], [0, 0, 1, 1], [], []>} : vector<8x8xbf16>, vector<8x8xbf16>, vector<8x8xf32> -> vector<8x8xf32>
    %24 = arith.truncf %23 : vector<8x8xf32> to vector<8x8xbf16>
    %c0_12 = arith.constant 0 : index
    %c0_13 = arith.constant 0 : index
    %c0_14 = arith.constant 0 : index
    %25 = vector.load %arg4[%c0_12, %c0_13, %c0_14] : memref<1x8x32xbf16, #tpu.memory_space<vmem>>, vector<1x8x8xbf16>
    %26 = vector.shape_cast %25 : vector<1x8x8xbf16> to vector<8x8xbf16>
    %27 = vector.shape_cast %24 : vector<8x8xbf16> to vector<1x8x8xbf16>
    tpu.vector_store %arg4[%c0_12, %c0_13, %c0_14], %27 {strides = array<i32>} : memref<1x8x32xbf16, #tpu.memory_space<vmem>>, vector<1x8x8xbf16>,
    %c0_15 = arith.constant 0 : index
    %c0_16 = arith.constant 0 : index
    %c0_17 = arith.constant 0 : index
    %c0_18 = arith.constant 0 : index
    %28 = vector.load %arg5[%c0_15, %c0_16, %c0_17, %c0_18] : memref<1x4x8x8xf32, #tpu.memory_space<vmem>>, vector<1x1x8x8xf32>
    %29 = vector.shape_cast %28 : vector<1x1x8x8xf32> to vector<8x8xf32>
    %30 = vector.shape_cast %20 : vector<8x8xf32> to vector<1x1x8x8xf32>
    tpu.vector_store %arg5[%c0_15, %c0_16, %c0_17, %c0_18], %30 {strides = array<i32>} : memref<1x4x8x8xf32, #tpu.memory_space<vmem>>, vector<1x1x8x8xf32>,
    %31 = vector.extract_strided_slice %1 {offsets = [0, 8], sizes = [8, 8], strides = [1, 1]} : vector<8x32xbf16> to vector<8x8xbf16>
    %32 = vector.extract_strided_slice %3 {offsets = [0, 8], sizes = [8, 8], strides = [1, 1]} : vector<8x32xbf16> to vector<8x8xbf16>
    %cst_19 = arith.constant dense<0.000000e+00> : vector<8x8xf32>
    %33 = tpu.matmul %31, %32, %cst_19 {dimension_numbers = #tpu.dot_dimension_numbers<[1], [1], [0], [0], [0, 0, 1, 0], [], []>} : vector<8x8xbf16>, vector<8x8xbf16>, vector<8x8xf32> -> vector<8x8xf32>
    %cst_20 = arith.constant 0.353553385 : f32
    %34 = vector.broadcast %cst_20 : f32 to vector<8x8xf32>
    %35 = arith.mulf %33, %34 : vector<8x8xf32>
    %cst_21 = arith.constant dense<0xFF800000> : vector<8xf32>
    %36 = vector.multi_reduction <maximumf>, %35, %cst_21 [1] : vector<8x8xf32> to vector<8xf32>
    %37 = vector.shape_cast %36 : vector<8xf32> to vector<8x1xf32>
    %38 = vector.broadcast %37 : vector<8x1xf32> to vector<8x8xf32>
    %39 = arith.subf %35, %38 : vector<8x8xf32>
    %40 = math.exp %39 : vector<8x8xf32>
    %cst_22 = arith.constant dense<0.000000e+00> : vector<8xf32>
    %41 = vector.multi_reduction <add>, %40, %cst_22 [1] : vector<8x8xf32> to vector<8xf32>
    %42 = vector.shape_cast %41 : vector<8xf32> to vector<8x1xf32>
    %43 = tpu.reciprocal %42 {approx = true} : vector<8x1xf32> -> vector<8x1xf32>
    %44 = vector.broadcast %43 : vector<8x1xf32> to vector<8x8xf32>
    %45 = arith.mulf %40, %44 : vector<8x8xf32>
    %46 = arith.truncf %45 : vector<8x8xf32> to vector<8x8xbf16>
    %47 = vector.extract_strided_slice %5 {offsets = [0, 8], sizes = [8, 8], strides = [1, 1]} : vector<8x32xbf16> to vector<8x8xbf16>
    %cst_23 = arith.constant dense<0.000000e+00> : vector<8x8xf32>
    %48 = tpu.matmul %46, %47, %cst_23 {dimension_numbers = #tpu.dot_dimension_numbers<[1], [0], [0], [1], [0, 0, 1, 1], [], []>} : vector<8x8xbf16>, vector<8x8xbf16>, vector<8x8xf32> -> vector<8x8xf32>
    %49 = arith.truncf %48 : vector<8x8xf32> to vector<8x8xbf16>
    %c0_24 = arith.constant 0 : index
    %c0_25 = arith.constant 0 : index
    %c8 = arith.constant 8 : index
    %50 = vector.load %arg4[%c0_24, %c0_25, %c8] : memref<1x8x32xbf16, #tpu.memory_space<vmem>>, vector<1x8x8xbf16>
    %51 = vector.shape_cast %50 : vector<1x8x8xbf16> to vector<8x8xbf16>
    %52 = vector.shape_cast %49 : vector<8x8xbf16> to vector<1x8x8xbf16>
    tpu.vector_store %arg4[%c0_24, %c0_25, %c8], %52 {strides = array<i32>} : memref<1x8x32xbf16, #tpu.memory_space<vmem>>, vector<1x8x8xbf16>,
    %c0_26 = arith.constant 0 : index
    %c1 = arith.constant 1 : index
    %c0_27 = arith.constant 0 : index
    %c0_28 = arith.constant 0 : index
    %53 = vector.load %arg5[%c0_26, %c1, %c0_27, %c0_28] : memref<1x4x8x8xf32, #tpu.memory_space<vmem>>, vector<1x1x8x8xf32>
    %54 = vector.shape_cast %53 : vector<1x1x8x8xf32> to vector<8x8xf32>
    %55 = vector.shape_cast %45 : vector<8x8xf32> to vector<1x1x8x8xf32>
    tpu.vector_store %arg5[%c0_26, %c1, %c0_27, %c0_28], %55 {strides = array<i32>} : memref<1x4x8x8xf32, #tpu.memory_space<vmem>>, vector<1x1x8x8xf32>,
    %56 = arith.addf %20, %45 : vector<8x8xf32>
    %57 = vector.extract_strided_slice %1 {offsets = [0, 16], sizes = [8, 8], strides = [1, 1]} : vector<8x32xbf16> to vector<8x8xbf16>
    %58 = vector.extract_strided_slice %3 {offsets = [0, 16], sizes = [8, 8], strides = [1, 1]} : vector<8x32xbf16> to vector<8x8xbf16>
    %cst_29 = arith.constant dense<0.000000e+00> : vector<8x8xf32>
    %59 = tpu.matmul %57, %58, %cst_29 {dimension_numbers = #tpu.dot_dimension_numbers<[1], [1], [0], [0], [0, 0, 1, 0], [], []>} : vector<8x8xbf16>, vector<8x8xbf16>, vector<8x8xf32> -> vector<8x8xf32>
    %cst_30 = arith.constant 0.353553385 : f32
    %60 = vector.broadcast %cst_30 : f32 to vector<8x8xf32>
    %61 = arith.mulf %59, %60 : vector<8x8xf32>
    %cst_31 = arith.constant dense<0xFF800000> : vector<8xf32>
    %62 = vector.multi_reduction <maximumf>, %61, %cst_31 [1] : vector<8x8xf32> to vector<8xf32>
    %63 = vector.shape_cast %62 : vector<8xf32> to vector<8x1xf32>
    %64 = vector.broadcast %63 : vector<8x1xf32> to vector<8x8xf32>
    %65 = arith.subf %61, %64 : vector<8x8xf32>
    %66 = math.exp %65 : vector<8x8xf32>
    %cst_32 = arith.constant dense<0.000000e+00> : vector<8xf32>
    %67 = vector.multi_reduction <add>, %66, %cst_32 [1] : vector<8x8xf32> to vector<8xf32>
    %68 = vector.shape_cast %67 : vector<8xf32> to vector<8x1xf32>
    %69 = tpu.reciprocal %68 {approx = true} : vector<8x1xf32> -> vector<8x1xf32>
    %70 = vector.broadcast %69 : vector<8x1xf32> to vector<8x8xf32>
    %71 = arith.mulf %66, %70 : vector<8x8xf32>
    %72 = arith.truncf %71 : vector<8x8xf32> to vector<8x8xbf16>
    %73 = vector.extract_strided_slice %5 {offsets = [0, 16], sizes = [8, 8], strides = [1, 1]} : vector<8x32xbf16> to vector<8x8xbf16>
    %cst_33 = arith.constant dense<0.000000e+00> : vector<8x8xf32>
    %74 = tpu.matmul %72, %73, %cst_33 {dimension_numbers = #tpu.dot_dimension_numbers<[1], [0], [0], [1], [0, 0, 1, 1], [], []>} : vector<8x8xbf16>, vector<8x8xbf16>, vector<8x8xf32> -> vector<8x8xf32>
    %75 = arith.truncf %74 : vector<8x8xf32> to vector<8x8xbf16>
    %c0_34 = arith.constant 0 : index
    %c0_35 = arith.constant 0 : index
    %c16 = arith.constant 16 : index
    %76 = vector.load %arg4[%c0_34, %c0_35, %c16] : memref<1x8x32xbf16, #tpu.memory_space<vmem>>, vector<1x8x8xbf16>
    %77 = vector.shape_cast %76 : vector<1x8x8xbf16> to vector<8x8xbf16>
    %78 = vector.shape_cast %75 : vector<8x8xbf16> to vector<1x8x8xbf16>
    tpu.vector_store %arg4[%c0_34, %c0_35, %c16], %78 {strides = array<i32>} : memref<1x8x32xbf16, #tpu.memory_space<vmem>>, vector<1x8x8xbf16>,
    %c0_36 = arith.constant 0 : index
    %c2 = arith.constant 2 : index
    %c0_37 = arith.constant 0 : index
    %c0_38 = arith.constant 0 : index
    %79 = vector.load %arg5[%c0_36, %c2, %c0_37, %c0_38] : memref<1x4x8x8xf32, #tpu.memory_space<vmem>>, vector<1x1x8x8xf32>
    %80 = vector.shape_cast %79 : vector<1x1x8x8xf32> to vector<8x8xf32>
    %81 = vector.shape_cast %71 : vector<8x8xf32> to vector<1x1x8x8xf32>
    tpu.vector_store %arg5[%c0_36, %c2, %c0_37, %c0_38], %81 {strides = array<i32>} : memref<1x4x8x8xf32, #tpu.memory_space<vmem>>, vector<1x1x8x8xf32>,
    %82 = arith.addf %56, %71 : vector<8x8xf32>
    %83 = vector.extract_strided_slice %1 {offsets = [0, 24], sizes = [8, 8], strides = [1, 1]} : vector<8x32xbf16> to vector<8x8xbf16>
    %84 = vector.extract_strided_slice %3 {offsets = [0, 24], sizes = [8, 8], strides = [1, 1]} : vector<8x32xbf16> to vector<8x8xbf16>
    %cst_39 = arith.constant dense<0.000000e+00> : vector<8x8xf32>
    %85 = tpu.matmul %83, %84, %cst_39 {dimension_numbers = #tpu.dot_dimension_numbers<[1], [1], [0], [0], [0, 0, 1, 0], [], []>} : vector<8x8xbf16>, vector<8x8xbf16>, vector<8x8xf32> -> vector<8x8xf32>
    %cst_40 = arith.constant 0.353553385 : f32
    %86 = vector.broadcast %cst_40 : f32 to vector<8x8xf32>
    %87 = arith.mulf %85, %86 : vector<8x8xf32>
    %cst_41 = arith.constant dense<0xFF800000> : vector<8xf32>
    %88 = vector.multi_reduction <maximumf>, %87, %cst_41 [1] : vector<8x8xf32> to vector<8xf32>
    %89 = vector.shape_cast %88 : vector<8xf32> to vector<8x1xf32>
    %90 = vector.broadcast %89 : vector<8x1xf32> to vector<8x8xf32>
    %91 = arith.subf %87, %90 : vector<8x8xf32>
    %92 = math.exp %91 : vector<8x8xf32>
    %cst_42 = arith.constant dense<0.000000e+00> : vector<8xf32>
    %93 = vector.multi_reduction <add>, %92, %cst_42 [1] : vector<8x8xf32> to vector<8xf32>
    %94 = vector.shape_cast %93 : vector<8xf32> to vector<8x1xf32>
    %95 = tpu.reciprocal %94 {approx = true} : vector<8x1xf32> -> vector<8x1xf32>
    %96 = vector.broadcast %95 : vector<8x1xf32> to vector<8x8xf32>
    %97 = arith.mulf %92, %96 : vector<8x8xf32>
    %98 = arith.truncf %97 : vector<8x8xf32> to vector<8x8xbf16>
    %99 = vector.extract_strided_slice %5 {offsets = [0, 24], sizes = [8, 8], strides = [1, 1]} : vector<8x32xbf16> to vector<8x8xbf16>
    %cst_43 = arith.constant dense<0.000000e+00> : vector<8x8xf32>
    %100 = tpu.matmul %98, %99, %cst_43 {dimension_numbers = #tpu.dot_dimension_numbers<[1], [0], [0], [1], [0, 0, 1, 1], [], []>} : vector<8x8xbf16>, vector<8x8xbf16>, vector<8x8xf32> -> vector<8x8xf32>
    %101 = arith.truncf %100 : vector<8x8xf32> to vector<8x8xbf16>
    %c0_44 = arith.constant 0 : index
    %c0_45 = arith.constant 0 : index
    %c24 = arith.constant 24 : index
    %102 = vector.load %arg4[%c0_44, %c0_45, %c24] : memref<1x8x32xbf16, #tpu.memory_space<vmem>>, vector<1x8x8xbf16>
    %103 = vector.shape_cast %102 : vector<1x8x8xbf16> to vector<8x8xbf16>
    %104 = vector.shape_cast %101 : vector<8x8xbf16> to vector<1x8x8xbf16>
    tpu.vector_store %arg4[%c0_44, %c0_45, %c24], %104 {strides = array<i32>} : memref<1x8x32xbf16, #tpu.memory_space<vmem>>, vector<1x8x8xbf16>,
    %c0_46 = arith.constant 0 : index
    %c3 = arith.constant 3 : index
    %c0_47 = arith.constant 0 : index
    %c0_48 = arith.constant 0 : index
    %105 = vector.load %arg5[%c0_46, %c3, %c0_47, %c0_48] : memref<1x4x8x8xf32, #tpu.memory_space<vmem>>, vector<1x1x8x8xf32>
    %106 = vector.shape_cast %105 : vector<1x1x8x8xf32> to vector<8x8xf32>
    %107 = vector.shape_cast %97 : vector<8x8xf32> to vector<1x1x8x8xf32>
    tpu.vector_store %arg5[%c0_46, %c3, %c0_47, %c0_48], %107 {strides = array<i32>} : memref<1x4x8x8xf32, #tpu.memory_space<vmem>>, vector<1x1x8x8xf32>,
    %108 = arith.addf %82, %97 : vector<8x8xf32>
    %cst_49 = arith.constant 2.500000e-01 : f32
    %109 = vector.broadcast %cst_49 : f32 to vector<8x8xf32>
    %110 = arith.mulf %108, %109 : vector<8x8xf32>
    %c0_50 = arith.constant 0 : index
    %c0_51 = arith.constant 0 : index
    %c0_52 = arith.constant 0 : index
    %111 = vector.load %arg6[%c0_50, %c0_51, %c0_52] : memref<1x8x8xf32, #tpu.memory_space<vmem>>, vector<1x8x8xf32>
    %112 = vector.shape_cast %111 : vector<1x8x8xf32> to vector<8x8xf32>
    %113 = vector.shape_cast %110 : vector<8x8xf32> to vector<1x8x8xf32>
    tpu.vector_store %arg6[%c0_50, %c0_51, %c0_52], %113 {strides = array<i32>} : memref<1x8x8xf32, #tpu.memory_space<vmem>>, vector<1x8x8xf32>,
    return
  }
  func.func @transform_0(%arg0: i32) -> (i32, i32, i32) {
    %c0_i32 = arith.constant 0 : i32
    %c0_i32_0 = arith.constant 0 : i32
    %c0_i32_1 = arith.constant 0 : i32
    return %arg0, %c0_i32, %c0_i32_0 : i32, i32, i32
  }
  func.func @transform_1(%arg0: i32) -> (i32, i32, i32) {
    %c0_i32 = arith.constant 0 : i32
    %c0_i32_0 = arith.constant 0 : i32
    %c0_i32_1 = arith.constant 0 : i32
    return %arg0, %c0_i32, %c0_i32_0 : i32, i32, i32
  }
  func.func @transform_2(%arg0: i32) -> (i32, i32, i32) {
    %c0_i32 = arith.constant 0 : i32
    %c0_i32_0 = arith.constant 0 : i32
    %c0_i32_1 = arith.constant 0 : i32
    return %arg0, %c0_i32, %c0_i32_0 : i32, i32, i32
  }
  func.func @transform_3(%arg0: i32) -> (i32, i32, i32) {
    %c0_i32 = arith.constant 0 : i32
    %c0_i32_0 = arith.constant 0 : i32
    %c0_i32_1 = arith.constant 0 : i32
    return %arg0, %c0_i32, %c0_i32_0 : i32, i32, i32
  }
  func.func @transform_4(%arg0: i32) -> (i32, i32, i32, i32) {
    %c0_i32 = arith.constant 0 : i32
    %c0_i32_0 = arith.constant 0 : i32
    %c0_i32_1 = arith.constant 0 : i32
    %c0_i32_2 = arith.constant 0 : i32
    return %arg0, %c0_i32, %c0_i32_0, %c0_i32_1 : i32, i32, i32, i32
  }
  func.func @transform_5(%arg0: i32) -> (i32, i32, i32) {
    %c0_i32 = arith.constant 0 : i32
    %c0_i32_0 = arith.constant 0 : i32
    %c0_i32_1 = arith.constant 0 : i32
    return %arg0, %c0_i32, %c0_i32_0 : i32, i32, i32
  }
}

module attributes {stable_mosaic.version = 11 : i64} {
  func.func @_ffn_ln_kernel(%arg0: i32, %arg1: i32, %arg2: memref<16x32xbf16, #tpu.memory_space<vmem>>, %arg3: memref<32x64xbf16, #tpu.memory_space<vmem>>, %arg4: memref<1x64xf32, #tpu.memory_space<vmem>>, %arg5: memref<64x32xbf16, #tpu.memory_space<vmem>>, %arg6: memref<1x32xf32, #tpu.memory_space<vmem>>, %arg7: memref<1x32xf32, #tpu.memory_space<vmem>>, %arg8: memref<1x32xf32, #tpu.memory_space<vmem>>, %arg9: memref<16x32xf32, #tpu.memory_space<vmem>>, %arg10: memref<16x32xf32, #tpu.memory_space<vmem>>) attributes {dimension_semantics = [#tpu.dimension_semantics<parallel>, #tpu.dimension_semantics<arbitrary>], iteration_bounds = array<i64: 1, 1>, scalar_prefetch = 0 : i64, scratch_operands = 1 : i64, tpu.core_type = #tpu.core_type<tc>, window_params = [{transform_indices = @transform_0, window_bounds = array<i64: 16, 32>}, {transform_indices = @transform_1, window_bounds = array<i64: 32, 64>}, {transform_indices = @transform_2, window_bounds = array<i64: 1, 64>}, {transform_indices = @transform_3, window_bounds = array<i64: 64, 32>}, {pipeline_mode = #tpu.pipeline_mode<synchronous>, transform_indices = @transform_4, window_bounds = array<i64: 1, 32>}, {pipeline_mode = #tpu.pipeline_mode<synchronous>, transform_indices = @transform_5, window_bounds = array<i64: 1, 32>}, {pipeline_mode = #tpu.pipeline_mode<synchronous>, transform_indices = @transform_6, window_bounds = array<i64: 1, 32>}, {transform_indices = @transform_7, window_bounds = array<i64: 16, 32>}]} {
    %c0_i32 = arith.constant 0 : i32
    %0 = arith.cmpi eq, %arg1, %c0_i32 : i32
    %1 = arith.extui %0 : i1 to i32
    %c0_i32_0 = arith.constant 0 : i32
    %2 = arith.cmpi ne, %1, %c0_i32_0 : i32
    scf.if %2 {
      %cst_16 = arith.constant 0.000000e+00 : f32
      %20 = vector.broadcast %cst_16 : f32 to vector<16x32xf32>
      %c0_17 = arith.constant 0 : index
      %c0_18 = arith.constant 0 : index
      %21 = vector.load %arg10[%c0_17, %c0_18] : memref<16x32xf32, #tpu.memory_space<vmem>>, vector<16x32xf32>
      tpu.vector_store %arg10[%c0_17, %c0_18], %20 {strides = array<i32>} : memref<16x32xf32, #tpu.memory_space<vmem>>, vector<16x32xf32>,
    } else {
    }
    %c0 = arith.constant 0 : index
    %c0_1 = arith.constant 0 : index
    %3 = vector.load %arg2[%c0, %c0_1] : memref<16x32xbf16, #tpu.memory_space<vmem>>, vector<16x32xbf16>
    %c0_2 = arith.constant 0 : index
    %c0_3 = arith.constant 0 : index
    %4 = vector.load %arg3[%c0_2, %c0_3] : memref<32x64xbf16, #tpu.memory_space<vmem>>, vector<32x64xbf16>
    %cst = arith.constant dense<0.000000e+00> : vector<16x64xf32>
    %5 = tpu.matmul %3, %4, %cst {dimension_numbers = #tpu.dot_dimension_numbers<[1], [0], [0], [1], [0, 0, 1, 1], [], []>} : vector<16x32xbf16>, vector<32x64xbf16>, vector<16x64xf32> -> vector<16x64xf32>
    %c0_4 = arith.constant 0 : index
    %c0_5 = arith.constant 0 : index
    %6 = vector.load %arg4[%c0_4, %c0_5] : memref<1x64xf32, #tpu.memory_space<vmem>>, vector<1x64xf32>
    %7 = vector.broadcast %6 : vector<1x64xf32> to vector<16x64xf32>
    %8 = arith.addf %5, %7 : vector<16x64xf32>
    %cst_6 = arith.constant 0.000000e+00 : f32
    %9 = vector.broadcast %cst_6 : f32 to vector<16x64xf32>
    %10 = arith.maximumf %8, %9 : vector<16x64xf32>
    %11 = arith.truncf %10 : vector<16x64xf32> to vector<16x64xbf16>
    %c0_7 = arith.constant 0 : index
    %c0_8 = arith.constant 0 : index
    %12 = vector.load %arg10[%c0_7, %c0_8] : memref<16x32xf32, #tpu.memory_space<vmem>>, vector<16x32xf32>
    %c0_9 = arith.constant 0 : index
    %c0_10 = arith.constant 0 : index
    %13 = vector.load %arg5[%c0_9, %c0_10] : memref<64x32xbf16, #tpu.memory_space<vmem>>, vector<64x32xbf16>
    %cst_11 = arith.constant dense<0.000000e+00> : vector<16x32xf32>
    %14 = tpu.matmul %11, %13, %cst_11 {dimension_numbers = #tpu.dot_dimension_numbers<[1], [0], [0], [1], [0, 0, 1, 1], [], []>} : vector<16x64xbf16>, vector<64x32xbf16>, vector<16x32xf32> -> vector<16x32xf32>
    %15 = arith.addf %12, %14 : vector<16x32xf32>
    %c0_12 = arith.constant 0 : index
    %c0_13 = arith.constant 0 : index
    %16 = vector.load %arg10[%c0_12, %c0_13] : memref<16x32xf32, #tpu.memory_space<vmem>>, vector<16x32xf32>
    tpu.vector_store %arg10[%c0_12, %c0_13], %15 {strides = array<i32>} : memref<16x32xf32, #tpu.memory_space<vmem>>, vector<16x32xf32>,
    %c0_i32_14 = arith.constant 0 : i32
    %17 = arith.cmpi eq, %arg1, %c0_i32_14 : i32
    %18 = arith.extui %17 : i1 to i32
    %c0_i32_15 = arith.constant 0 : i32
    %19 = arith.cmpi ne, %18, %c0_i32_15 : i32
    scf.if %19 {
      %c0_16 = arith.constant 0 : index
      %c0_17 = arith.constant 0 : index
      %20 = vector.load %arg10[%c0_16, %c0_17] : memref<16x32xf32, #tpu.memory_space<vmem>>, vector<16x32xf32>
      %c0_18 = arith.constant 0 : index
      %c0_19 = arith.constant 0 : index
      %21 = vector.load %arg6[%c0_18, %c0_19] : memref<1x32xf32, #tpu.memory_space<vmem>>, vector<1x32xf32>
      %22 = vector.broadcast %21 : vector<1x32xf32> to vector<16x32xf32>
      %23 = arith.addf %20, %22 : vector<16x32xf32>
      %24 = arith.extf %3 : vector<16x32xbf16> to vector<16x32xf32>
      %25 = arith.addf %23, %24 : vector<16x32xf32>
      %cst_20 = arith.constant dense<0.000000e+00> : vector<16xf32>
      %26 = vector.multi_reduction <add>, %25, %cst_20 [1] : vector<16x32xf32> to vector<16xf32>
      %27 = vector.shape_cast %26 : vector<16xf32> to vector<16x1xf32>
      %cst_21 = arith.constant 3.200000e+01 : f32
      %28 = vector.broadcast %cst_21 : f32 to vector<16x1xf32>
      %29 = arith.divf %27, %28 : vector<16x1xf32>
      %30 = vector.broadcast %29 : vector<16x1xf32> to vector<16x32xf32>
      %31 = arith.subf %25, %30 : vector<16x32xf32>
      %32 = arith.mulf %31, %31 : vector<16x32xf32>
      %cst_22 = arith.constant dense<0.000000e+00> : vector<16xf32>
      %33 = vector.multi_reduction <add>, %32, %cst_22 [1] : vector<16x32xf32> to vector<16xf32>
      %34 = vector.shape_cast %33 : vector<16xf32> to vector<16x1xf32>
      %cst_23 = arith.constant 3.200000e+01 : f32
      %35 = vector.broadcast %cst_23 : f32 to vector<16x1xf32>
      %36 = arith.divf %34, %35 : vector<16x1xf32>
      %37 = vector.broadcast %29 : vector<16x1xf32> to vector<16x32xf32>
      %38 = arith.subf %25, %37 : vector<16x32xf32>
      %cst_24 = arith.constant 9.99999974E-6 : f32
      %39 = vector.broadcast %cst_24 : f32 to vector<16x1xf32>
      %40 = arith.addf %36, %39 : vector<16x1xf32>
      %41 = math.rsqrt %40 : vector<16x1xf32>
      %42 = vector.broadcast %41 : vector<16x1xf32> to vector<16x32xf32>
      %43 = arith.mulf %38, %42 : vector<16x32xf32>
      %c0_25 = arith.constant 0 : index
      %c0_26 = arith.constant 0 : index
      %44 = vector.load %arg7[%c0_25, %c0_26] : memref<1x32xf32, #tpu.memory_space<vmem>>, vector<1x32xf32>
      %45 = vector.broadcast %44 : vector<1x32xf32> to vector<16x32xf32>
      %46 = arith.mulf %43, %45 : vector<16x32xf32>
      %c0_27 = arith.constant 0 : index
      %c0_28 = arith.constant 0 : index
      %47 = vector.load %arg8[%c0_27, %c0_28] : memref<1x32xf32, #tpu.memory_space<vmem>>, vector<1x32xf32>
      %48 = vector.broadcast %47 : vector<1x32xf32> to vector<16x32xf32>
      %49 = arith.addf %46, %48 : vector<16x32xf32>
      %c0_29 = arith.constant 0 : index
      %c0_30 = arith.constant 0 : index
      %50 = vector.load %arg9[%c0_29, %c0_30] : memref<16x32xf32, #tpu.memory_space<vmem>>, vector<16x32xf32>
      tpu.vector_store %arg9[%c0_29, %c0_30], %49 {strides = array<i32>} : memref<16x32xf32, #tpu.memory_space<vmem>>, vector<16x32xf32>,
    } else {
    }
    return
  }
  func.func @transform_0(%arg0: i32, %arg1: i32) -> (i32, i32) {
    %c0_i32 = arith.constant 0 : i32
    %c0_i32_0 = arith.constant 0 : i32
    return %arg0, %c0_i32 : i32, i32
  }
  func.func @transform_1(%arg0: i32, %arg1: i32) -> (i32, i32) {
    %c0_i32 = arith.constant 0 : i32
    %c0_i32_0 = arith.constant 0 : i32
    return %c0_i32, %arg1 : i32, i32
  }
  func.func @transform_2(%arg0: i32, %arg1: i32) -> (i32, i32) {
    %c0_i32 = arith.constant 0 : i32
    %c0_i32_0 = arith.constant 0 : i32
    return %c0_i32, %arg1 : i32, i32
  }
  func.func @transform_3(%arg0: i32, %arg1: i32) -> (i32, i32) {
    %c0_i32 = arith.constant 0 : i32
    %c0_i32_0 = arith.constant 0 : i32
    return %arg1, %c0_i32 : i32, i32
  }
  func.func @transform_4(%arg0: i32, %arg1: i32) -> (i32, i32) {
    %c0_i32 = arith.constant 0 : i32
    %c0_i32_0 = arith.constant 0 : i32
    %c0_i32_1 = arith.constant 0 : i32
    return %c0_i32, %c0_i32_0 : i32, i32
  }
  func.func @transform_5(%arg0: i32, %arg1: i32) -> (i32, i32) {
    %c0_i32 = arith.constant 0 : i32
    %c0_i32_0 = arith.constant 0 : i32
    %c0_i32_1 = arith.constant 0 : i32
    return %c0_i32, %c0_i32_0 : i32, i32
  }
  func.func @transform_6(%arg0: i32, %arg1: i32) -> (i32, i32) {
    %c0_i32 = arith.constant 0 : i32
    %c0_i32_0 = arith.constant 0 : i32
    %c0_i32_1 = arith.constant 0 : i32
    return %c0_i32, %c0_i32_0 : i32, i32
  }
  func.func @transform_7(%arg0: i32, %arg1: i32) -> (i32, i32) {
    %c0_i32 = arith.constant 0 : i32
    %c0_i32_0 = arith.constant 0 : i32
    return %arg0, %c0_i32 : i32, i32
  }
}

module attributes {stable_mosaic.version = 11 : i64} {
  func.func @_proj_ln_kernel(%arg0: i32, %arg1: memref<16x32xbf16, #tpu.memory_space<vmem>>, %arg2: memref<16x32xbf16, #tpu.memory_space<vmem>>, %arg3: memref<32x32xbf16, #tpu.memory_space<vmem>>, %arg4: memref<1x32xf32, #tpu.memory_space<vmem>>, %arg5: memref<1x32xf32, #tpu.memory_space<vmem>>, %arg6: memref<1x32xf32, #tpu.memory_space<vmem>>, %arg7: memref<16x32xbf16, #tpu.memory_space<vmem>>) attributes {dimension_semantics = [#tpu.dimension_semantics<parallel>], iteration_bounds = array<i64: 1>, scalar_prefetch = 0 : i64, scratch_operands = 0 : i64, tpu.core_type = #tpu.core_type<tc>, window_params = [{transform_indices = @transform_0, window_bounds = array<i64: 16, 32>}, {transform_indices = @transform_1, window_bounds = array<i64: 16, 32>}, {pipeline_mode = #tpu.pipeline_mode<synchronous>, transform_indices = @transform_2, window_bounds = array<i64: 32, 32>}, {pipeline_mode = #tpu.pipeline_mode<synchronous>, transform_indices = @transform_3, window_bounds = array<i64: 1, 32>}, {pipeline_mode = #tpu.pipeline_mode<synchronous>, transform_indices = @transform_4, window_bounds = array<i64: 1, 32>}, {pipeline_mode = #tpu.pipeline_mode<synchronous>, transform_indices = @transform_5, window_bounds = array<i64: 1, 32>}, {transform_indices = @transform_6, window_bounds = array<i64: 16, 32>}]} {
    %c0 = arith.constant 0 : index
    %c0_0 = arith.constant 0 : index
    %0 = vector.load %arg1[%c0, %c0_0] : memref<16x32xbf16, #tpu.memory_space<vmem>>, vector<16x32xbf16>
    %c0_1 = arith.constant 0 : index
    %c0_2 = arith.constant 0 : index
    %1 = vector.load %arg3[%c0_1, %c0_2] : memref<32x32xbf16, #tpu.memory_space<vmem>>, vector<32x32xbf16>
    %cst = arith.constant dense<0.000000e+00> : vector<16x32xf32>
    %2 = tpu.matmul %0, %1, %cst {dimension_numbers = #tpu.dot_dimension_numbers<[1], [0], [0], [1], [0, 0, 1, 1], [], []>} : vector<16x32xbf16>, vector<32x32xbf16>, vector<16x32xf32> -> vector<16x32xf32>
    %c0_3 = arith.constant 0 : index
    %c0_4 = arith.constant 0 : index
    %3 = vector.load %arg4[%c0_3, %c0_4] : memref<1x32xf32, #tpu.memory_space<vmem>>, vector<1x32xf32>
    %4 = vector.broadcast %3 : vector<1x32xf32> to vector<16x32xf32>
    %5 = arith.addf %2, %4 : vector<16x32xf32>
    %c0_5 = arith.constant 0 : index
    %c0_6 = arith.constant 0 : index
    %6 = vector.load %arg2[%c0_5, %c0_6] : memref<16x32xbf16, #tpu.memory_space<vmem>>, vector<16x32xbf16>
    %7 = arith.extf %6 : vector<16x32xbf16> to vector<16x32xf32>
    %8 = arith.addf %5, %7 : vector<16x32xf32>
    %cst_7 = arith.constant dense<0.000000e+00> : vector<16xf32>
    %9 = vector.multi_reduction <add>, %8, %cst_7 [1] : vector<16x32xf32> to vector<16xf32>
    %10 = vector.shape_cast %9 : vector<16xf32> to vector<16x1xf32>
    %cst_8 = arith.constant 3.200000e+01 : f32
    %11 = vector.broadcast %cst_8 : f32 to vector<16x1xf32>
    %12 = arith.divf %10, %11 : vector<16x1xf32>
    %13 = vector.broadcast %12 : vector<16x1xf32> to vector<16x32xf32>
    %14 = arith.subf %8, %13 : vector<16x32xf32>
    %15 = arith.mulf %14, %14 : vector<16x32xf32>
    %cst_9 = arith.constant dense<0.000000e+00> : vector<16xf32>
    %16 = vector.multi_reduction <add>, %15, %cst_9 [1] : vector<16x32xf32> to vector<16xf32>
    %17 = vector.shape_cast %16 : vector<16xf32> to vector<16x1xf32>
    %cst_10 = arith.constant 3.200000e+01 : f32
    %18 = vector.broadcast %cst_10 : f32 to vector<16x1xf32>
    %19 = arith.divf %17, %18 : vector<16x1xf32>
    %20 = vector.broadcast %12 : vector<16x1xf32> to vector<16x32xf32>
    %21 = arith.subf %8, %20 : vector<16x32xf32>
    %cst_11 = arith.constant 9.99999974E-6 : f32
    %22 = vector.broadcast %cst_11 : f32 to vector<16x1xf32>
    %23 = arith.addf %19, %22 : vector<16x1xf32>
    %24 = math.rsqrt %23 : vector<16x1xf32>
    %25 = vector.broadcast %24 : vector<16x1xf32> to vector<16x32xf32>
    %26 = arith.mulf %21, %25 : vector<16x32xf32>
    %c0_12 = arith.constant 0 : index
    %c0_13 = arith.constant 0 : index
    %27 = vector.load %arg5[%c0_12, %c0_13] : memref<1x32xf32, #tpu.memory_space<vmem>>, vector<1x32xf32>
    %28 = vector.broadcast %27 : vector<1x32xf32> to vector<16x32xf32>
    %29 = arith.mulf %26, %28 : vector<16x32xf32>
    %c0_14 = arith.constant 0 : index
    %c0_15 = arith.constant 0 : index
    %30 = vector.load %arg6[%c0_14, %c0_15] : memref<1x32xf32, #tpu.memory_space<vmem>>, vector<1x32xf32>
    %31 = vector.broadcast %30 : vector<1x32xf32> to vector<16x32xf32>
    %32 = arith.addf %29, %31 : vector<16x32xf32>
    %33 = arith.truncf %32 : vector<16x32xf32> to vector<16x32xbf16>
    %c0_16 = arith.constant 0 : index
    %c0_17 = arith.constant 0 : index
    %34 = vector.load %arg7[%c0_16, %c0_17] : memref<16x32xbf16, #tpu.memory_space<vmem>>, vector<16x32xbf16>
    tpu.vector_store %arg7[%c0_16, %c0_17], %33 {strides = array<i32>} : memref<16x32xbf16, #tpu.memory_space<vmem>>, vector<16x32xbf16>,
    return
  }
  func.func @transform_0(%arg0: i32) -> (i32, i32) {
    %c0_i32 = arith.constant 0 : i32
    %c0_i32_0 = arith.constant 0 : i32
    return %arg0, %c0_i32 : i32, i32
  }
  func.func @transform_1(%arg0: i32) -> (i32, i32) {
    %c0_i32 = arith.constant 0 : i32
    %c0_i32_0 = arith.constant 0 : i32
    return %arg0, %c0_i32 : i32, i32
  }
  func.func @transform_2(%arg0: i32) -> (i32, i32) {
    %c0_i32 = arith.constant 0 : i32
    %c0_i32_0 = arith.constant 0 : i32
    %c0_i32_1 = arith.constant 0 : i32
    return %c0_i32, %c0_i32_0 : i32, i32
  }
  func.func @transform_3(%arg0: i32) -> (i32, i32) {
    %c0_i32 = arith.constant 0 : i32
    %c0_i32_0 = arith.constant 0 : i32
    %c0_i32_1 = arith.constant 0 : i32
    return %c0_i32, %c0_i32_0 : i32, i32
  }
  func.func @transform_4(%arg0: i32) -> (i32, i32) {
    %c0_i32 = arith.constant 0 : i32
    %c0_i32_0 = arith.constant 0 : i32
    %c0_i32_1 = arith.constant 0 : i32
    return %c0_i32, %c0_i32_0 : i32, i32
  }
  func.func @transform_5(%arg0: i32) -> (i32, i32) {
    %c0_i32 = arith.constant 0 : i32
    %c0_i32_0 = arith.constant 0 : i32
    %c0_i32_1 = arith.constant 0 : i32
    return %c0_i32, %c0_i32_0 : i32, i32
  }
  func.func @transform_6(%arg0: i32) -> (i32, i32) {
    %c0_i32 = arith.constant 0 : i32
    %c0_i32_0 = arith.constant 0 : i32
    return %arg0, %c0_i32 : i32, i32
  }
}

</mosaic_0001>

<bundles_post_ra>
// kernel: transformer_decoder_layer.10
= control target key start
LH: loop header
LB: loop body
LE: loop exit
PB: predicated region body
PF: predicated region fallthrough
CT: control target
= control target key end

     0   :  { %vm53_vm0 = vcmask 261120   ;;  %vm73_vm1 = vcmask 257024   ;;  %s234_s2 = inlined_call_operand.vmem [shape: bf16[32,32], index: 2, kind: input, shape index: {}]   ;;  %s235_s4 = inlined_call_operand.vmem [shape: bf16[32,32], index: 4, kind: input, shape index: {}]   ;;  %s236_s0 = inlined_call_operand.vmem [shape: f32[16,32], index: 0, kind: input, shape index: {}]   ;;  %s237_s1 = inlined_call_operand.vmem [shape: f32[16,32], index: 1, kind: input, shape index: {}]   ;;  %s238_s3 = inlined_call_operand.vmem [shape: f32[1,32], index: 3, kind: input, shape index: {}]   ;;  %s239_s5 = inlined_call_operand.vmem [shape: f32[1,32], index: 5, kind: input, shape index: {}]   ;;  %s240_s6 = inlined_call_operand.vmem [shape: bf16[16,32], index: 6, kind: output, shape index: {0}]   ;;  %s241_s7 = inlined_call_operand.vmem [shape: bf16[16,32], index: 7, kind: output, shape index: {1}]  }
   0x1   :  { %v147_v0 = vld [vmem:[%s234_s2 + $0x8] sm:$0xff]  ;;  %v146_v2 = vld [vmem:[%s234_s2] sm:$0xff] }
   0x2   :  { %v149_v1 = vld [vmem:[%s235_s4 + $0x8] sm:$0xff]  ;;  %v148_v3 = vld [vmem:[%s235_s4] sm:$0xff]  ;;  %63 = vmatpush.bf16.msra.mxu0 %v147_v0 }
   0x3   :  { %v26_v4 = vld [vmem:[%s236_s0] sm:$0xff]  ;;  %v27_v5 = vld [vmem:[%s236_s0 + $0x8] sm:$0xff]  ;;  %108 = vmatpush.bf16.msra.mxu1 %v149_v1 }
   0x4   :  { %v28_v6 = vld [vmem:[%s237_s1] sm:$0xff]  ;;  %v29_v7 = vld [vmem:[%s237_s1 + $0x8] sm:$0xff]  ;;  %v78_v11 = vpack.c.bf16 %v27_v5, %v26_v4 }
   0x5   :  { %v30_v8 = vadd.f32 %v28_v6, %v26_v4  ;;  %v31_v9 = vadd.f32 %v29_v7, %v27_v5  ;;  %v150_v12 = vld [vmem:[%s238_s3] ss:$0 sm:$0xff] }
   0x6   :  { %64 = vmatpush.bf16.msra.mxu0 %v146_v2  ;;  %v151_v13 = vld [vmem:[%s239_s5] ss:$0 sm:$0xff] }
   0x7   :  { %v32_v10 = vpack.c.bf16 %v31_v9, %v30_v8  ;;  %109 = vmatpush.bf16.msra.mxu1 %v148_v3 }
   0x9   :  { %136 = vmatmul.msk.bf16.vlgmr.msra.gmra.mxu0 %vm53_vm0, %v32_v10 }
   0xa   :  { %145 = vmatmul.msk.bf16.vlgmr.msra.gmra.mxu1 %vm53_vm0, %v78_v11 }
  0x86   :  { %v66_v14 = vpop.f32.mrf.mxu0 }
  0x87   :  { %v111_v15 = vpop.f32.mrf.mxu1  ;;  %v67_v16 = vadd.f32 %v150_v12, %v66_v14 }
  0x88   :  { %v112_v17 = vadd.f32 %v151_v13, %v111_v15 }
  0x89   :  { %v71_v18 = vpack.c.bf16 %v67_v16, %v67_v16 }
  0x8a   :  { %v116_v19 = vpack.c.bf16 %v112_v17, %v112_v17 }
  0x8b   :  { %74 = vst.msk [vmem:[%s240_s6] sm:$0xf] %vm73_vm1, %v71_v18 }
  0x8c   :  { %118 = vst.msk [vmem:[%s241_s7] sm:$0xf] %vm73_vm1, %v116_v19 }
  0x8e   :  { %v68_v20 = vpop.f32.mrf.mxu0 }
  0x8f   :  { %v113_v21 = vpop.f32.mrf.mxu1  ;;  %v69_v22 = vadd.f32 %v150_v12, %v68_v20 }
  0x90   :  { %v114_v23 = vadd.f32 %v151_v13, %v113_v21 }
  0x91   :  { %v72_v24 = vpack.c.bf16 %v69_v22, %v69_v22 }
  0x92   :  { %v117_v25 = vpack.c.bf16 %v114_v23, %v114_v23 }
  0x93   :  { %75 = vst.msk [vmem:[%s240_s6 + $0x4] sm:$0xf] %vm73_vm1, %v72_v24 }
  0x94   :  { %119 = vst.msk [vmem:[%s241_s7 + $0x4] sm:$0xf] %vm73_vm1, %v117_v25 }

// kernel: transformer_decoder_layer.8
= control target key start
LH: loop header
LB: loop body
LE: loop exit
PB: predicated region body
PF: predicated region fallthrough
CT: control target
= control target key end

     0   :  { %s621_s12 = smov 0   ;;  %s689_s0 = inlined_call_operand.vmem [shape: bf16[2,8,32], index: 0, kind: input, shape index: {}]   ;;  %s690_s1 = inlined_call_operand.vmem [shape: bf16[2,8,32], index: 1, kind: input, shape index: {}]   ;;  %s691_s2 = inlined_call_operand.vmem [shape: bf16[2,8,32], index: 2, kind: input, shape index: {}]   ;;  %s692_s3 = inlined_call_operand.vmem [shape: bf16[2,8,32], index: 3, kind: output, shape index: {}]  }
   0x1 LB: > { %s538_s13 = sadd.s32 4294967295, %s593_s12   ;;  %p542_p0 = scmp.ge.s32.totalorder %s593_s12, 1  ;;  %s593_s12 = sphi %s621_s12, %s13_s12  }
   0x2   : > { %p154_p1 = scmp.lt.s32.totalorder %s593_s12, 3 }
   0x4   : > { %p155_p2 = pnand %p542_p0, %p154_p1 }
   0x5   : > { %p184_p3 = scmp.lt.s32.totalorder (!%p155_p2), %s538_s13, 1  ;;  %s595_s21 = smov (!%p155_p2), 112  }
   0x6   : > { %158 = sbr.rel (%p155_p2) target bundleno = 1080 (0x438), region = 32  ;;  %s596_s22 = smov (!%p155_p2), 104  }
   0x7   : > { %s597_s23 = smov (!%p155_p2), 120   ;;  %s598_s30 = smov (!%p155_p2), 8  }
   0x8   : > { %s599_s4 = smov (!%p155_p2), 16   ;;  %s600_s5 = smov (!%p155_p2), 24  }
   0xb   : > { %s694_s13 = smov (!%p184_p3, %s538_s13), 1  ;;  %vm204_vm0 = vcmask 64512   ;;  %vm240_vm1 = vcmask 1043456   ;;  %vm258_vm2 = vcmask 60416   ;;  %vm331_vm3 = vcmask 126016  }
   0xc   : > { %s629_s14 = sshll.u32 %s694_s13, 2  ;;  %vm395_vm4 = vcmask 191616   ;;  %vm459_vm5 = vcmask 257216  }
   0xd   : > { %s191_s17 = scalar_lea.vmem %s690_s1, %s629_s14  ;;  %s187_s20 = scalar_lea.vmem %s689_s0, %s629_s14 }
   0xe   : > { %v202_v0 = vld [vmem:[%s191_s17] sm:$0xf]  ;;  %s195_s26 = scalar_lea.vmem %s691_s2, %s629_s14  ;;  %s666_s29 = scalar_lea.vmem %s692_s3, %s629_s14 }
   0xf   : > { %v209_v1 = vsel %vm204_vm0, %v202_v0, 0  ;;  %v201_v2 = vld [vmem:[%s187_s20] sm:$0xf]  ;;  %v266_v3 = vunpack.c.l.b16 %v202_v0 }
  0x10   : > { %218 = vmatpush.bf16.xpose.msra.mxu0 %v209_v1  ;;  %v261_v5 = vunpack.c.l.b16 %v201_v2  ;;  %v203_v21 = vld [vmem:[%s195_s26] sm:$0xf] }
  0x11   : > { %v267_v4 = vpack.c.b16 %v266_v3, %v266_v3  ;;  %v242_v22 = vsel %vm240_vm1, %v203_v21, 0  ;;  %v303_v46 = vunpack.c.l.b16 %v203_v21 }
  0x12   : > { %v262_v6 = vpack.c.b16 %v261_v5, %v261_v5  ;;  %251 = vmatpush.bf16.msra.mxu1 %v242_v22 }
  0x13   : > { %335 = vrot.lane.b32.xlu2 %v267_v4, %s595_s21  ;;  %v304_v47 = vpack.c.b16 %v303_v46, %v303_v46 }
  0x17   : > { %547 = vmatmul.msk.bf16.vlgmr.msra.gmra.mxu0 %vm204_vm0, %v201_v2 }
  0x1b   : > { %399 = vrot.lane.b32.xlu2 %v267_v4, %s596_s22 }
  0x23   : > { %333 = vrot.lane.b32.xlu2 %v262_v6, %s595_s21 }
  0x2b   : > { %397 = vrot.lane.b32.xlu2 %v262_v6, %s596_s22 }
  0x6d   : > { %v336_v11 = vpop.permute.xlu2 %335 }
  0x6e   : > { %v341_v23 = vsel %vm204_vm0, %v336_v11, 0 }
  0x6f   : > { %350 = vmatpush.bf16.xpose.msrb.mxu1 %v341_v23 }
  0x75   : > { %v400_v12 = vpop.permute.xlu2 %399 }
  0x76   : > { %v405_v17 = vsel %vm204_vm0, %v400_v12, 0 }
  0x77   : > { %414 = vmatpush.bf16.xpose.msrb.mxu0 %v405_v17 }
  0x7d   : > { %v334_v16 = vpop.permute.xlu2 %333 }
  0x85   : > { %v398_v20 = vpop.permute.xlu2 %397 }
  0x86   : > { %553 = vmatmul.msk.bf16.vlgmr.msrb.gmra.mxu0 %vm204_vm0, %v398_v20 }
  0x94   : > { %v220_v7 = vpop.f32.mrf.mxu0 }
  0x95   : > { %v224_v8 = vmul.f32 0.35355338, %v220_v7 }
  0x97   : > { %v225_v9 = vsel %vm204_vm0, %v224_v8, -inf }
  0x98   : > { %226 = vmax.xlane.f32.xlu0 %v225_v9 }
  0x9c   : > { %v222_v10 = vpop.f32.mrf.mxu0 }
  0xac   : > { %268 = vrot.lane.b32.xlu0 %v267_v4, %s597_s23 }
 0x103   : > { %v416_v30 = vpop.f32.mrf.mxu0 }
 0x104   : > { %v420_v31 = vmul.f32 0.35355338, %v416_v30 }
 0x106   : > { %v421_v32 = vsel %vm204_vm0, %v420_v31, -inf }
 0x10b   : > { %v227_v13 = vpop.xlane.xlu0 %226  ;;  %v418_v33 = vpop.f32.mrf.mxu0 }
 0x10c   : > { %v228_v14 = vsub.f32 %v224_v8, %v227_v13 }
 0x10e   : > { %v229_v15 = vmul.f32 1.442695, %v228_v14 }
 0x110   : > { %571 = vpow2.f32 %v229_v15 }
 0x116   : > { %v572_v18 = vpop.eup %571 }
 0x117   : > { %v231_v19 = vsel %vm204_vm0, %v572_v18, 0.0 }
 0x118   : > { %232 = vadd.xlane.f32.xlu1 %v231_v19 }
 0x11e   : > { %v269_v24 = vpop.permute.xlu0 %268 }
 0x11f   : > { %v274_v25 = vsel %vm204_vm0, %v269_v24, 0 }
 0x120   : > { %283 = vmatpush.bf16.xpose.msra.mxu2 %v274_v25 }
 0x131   : > { %263 = vrot.lane.b32.xlu1 %v262_v6, %s597_s23 }
 0x15b   : > { %422 = vmax.xlane.f32.xlu1 %v421_v32 }
 0x18b   : > { %v233_v26 = vpop.xlane.xlu1 %232 }
 0x18c   : > { %573 = vrcp.f32 %v233_v26 }
 0x192   : > { %v574_v27 = vpop.eup %573 }
 0x193   : > { %v235_v28 = vmul.f32 %v574_v27, %v572_v18 }
 0x195   : > { %v236_v29 = vpack.c.bf16 %v235_v28, %v235_v28 }
 0x197   : > { %548 = vmatmul.msk.bf16.vlgmr.msra.gmra.mxu1 %vm204_vm0, %v236_v29 }
 0x1a3   : > { %v264_v34 = vpop.permute.xlu1 %263 }
 0x1a4   : > { %549 = vmatmul.msk.bf16.vlgmr.msra.gmra.mxu2 %vm204_vm0, %v264_v34 }
 0x1a7   : > { %551 = vmatmul.msk.bf16.vlgmr.msrb.gmra.mxu1 %vm204_vm0, %v334_v16 }
 0x1ce   : > { %v423_v50 = vpop.xlane.xlu1 %422 }
 0x1cf   : > { %v424_v54 = vsub.f32 %v420_v31, %v423_v50 }
 0x1d1   : > { %v425_v56 = vmul.f32 1.442695, %v424_v54 }
 0x214   : > { %v253_v35 = vpop.f32.mrf.mxu1 }
 0x215   : > { %v257_v36 = vpack.c.bf16 %v253_v35, %v253_v35 }
 0x217   : > { %259 = vst.msk [vmem:[%s666_s29] sm:$0xf] %vm258_vm2, %v257_v36 }
 0x21c   : > { %v255_v37 = vpop.f32.mrf.mxu1 }
 0x224   : > { %v352_v38 = vpop.f32.mrf.mxu1 }
 0x225   : > { %v356_v39 = vmul.f32 0.35355338, %v352_v38 }
 0x227   : > { %v285_v40 = vpop.f32.mrf.mxu2  ;;  %v357_v41 = vsel %vm204_vm0, %v356_v39, -inf }
 0x228   : > { %v289_v42 = vmul.f32 0.35355338, %v285_v40  ;;  %358 = vmax.xlane.f32.xlu2 %v357_v41 }
 0x22a   : > { %v290_v43 = vsel %vm204_vm0, %v289_v42, -inf }
 0x22b   : > { %291 = vmax.xlane.f32.xlu0 %v290_v43 }
 0x22c   : > { %v354_v44 = vpop.f32.mrf.mxu1 }
 0x22f   : > { %v287_v45 = vpop.f32.mrf.mxu2 }
 0x240   : > { %305 = vrot.lane.b32.xlu2 %v304_v47, %s597_s23 }
 0x29b   : > { %v359_v48 = vpop.xlane.xlu2 %358 }
 0x29c   : > { %v360_v49 = vsub.f32 %v356_v39, %v359_v48 }
 0x29e   : > { %v361_v51 = vmul.f32 1.442695, %v360_v49  ;;  %v292_v52 = vpop.xlane.xlu0 %291 }
 0x29f   : > { %v293_v53 = vsub.f32 %v289_v42, %v292_v52 }
 0x2a0   : > { %575 = vpow2.f32 %v361_v51 }
 0x2a1   : > { %v294_v55 = vmul.f32 1.442695, %v293_v53 }
 0x2a3   : > { %577 = vpow2.f32 %v294_v55  ;;  %v306_v63 = vpop.permute.xlu2 %305 }
 0x2a4   : > { %579 = vpow2.f32 %v425_v56  ;;  %v311_v0 = vsel %vm240_vm1, %v306_v63, 0 }
 0x2a5   : > { %320 = vmatpush.bf16.msra.mxu3 %v311_v0 }
 0x2a6   : > { %v576_v57 = vpop.eup %575 }
 0x2a7   : > { %v363_v58 = vsel %vm204_vm0, %v576_v57, 0.0 }
 0x2a8   : > { %364 = vadd.xlane.f32.xlu1 %v363_v58 }
 0x2a9   : > { %v578_v59 = vpop.eup %577 }
 0x2aa   : > { %v296_v60 = vsel %vm204_vm0, %v578_v59, 0.0  ;;  %v580_v61 = vpop.eup %579 }
 0x2ab   : > { %297 = vadd.xlane.f32.xlu0 %v296_v60  ;;  %v427_v62 = vsel %vm204_vm0, %v580_v61, 0.0 }
 0x2b3   : > { %428 = vadd.xlane.f32.xlu0 %v427_v62 }
 0x2c1   : > { %369 = vrot.lane.b32.xlu1 %v304_v47, %s595_s21 }
 0x2c7   : > { %433 = vrot.lane.b32.xlu0 %v304_v47, %s596_s22 }
 0x31b   : > { %v365_v4 = vpop.xlane.xlu1 %364 }
 0x31e   : > { %v298_v1 = vpop.xlane.xlu0 %297 }
 0x31f   : > { %581 = vrcp.f32 %v298_v1 }
 0x320   : > { %583 = vrcp.f32 %v365_v4 }
 0x325   : > { %v582_v2 = vpop.eup %581 }
 0x326   : > { %v300_v3 = vmul.f32 %v582_v2, %v578_v59  ;;  %v429_v6 = vpop.xlane.xlu0 %428  ;;  %v584_v7 = vpop.eup %583 }
 0x327   : > { %585 = vrcp.f32 %v429_v6  ;;  %v367_v9 = vmul.f32 %v584_v7, %v576_v57 }
 0x328   : > { %v301_v5 = vpack.c.bf16 %v300_v3, %v300_v3 }
 0x329   : > { %v368_v13 = vpack.c.bf16 %v367_v9, %v367_v9 }
 0x32a   : > { %550 = vmatmul.msk.bf16.vlgmr.msra.gmra.mxu3 %vm204_vm0, %v301_v5 }
 0x32d   : > { %v586_v11 = vpop.eup %585 }
 0x32e   : > { %v431_v12 = vmul.f32 %v586_v11, %v580_v61 }
 0x330   : > { %v432_v16 = vpack.c.bf16 %v431_v12, %v431_v12 }
 0x333   : > { %v370_v8 = vpop.permute.xlu1 %369 }
 0x334   : > { %v375_v10 = vsel %vm240_vm1, %v370_v8, 0 }
 0x335   : > { %384 = vmatpush.bf16.msrb.mxu3 %v375_v10 }
 0x339   : > { %v434_v14 = vpop.permute.xlu0 %433 }
 0x33a   : > { %552 = vmatmul.msk.bf16.vlgmr.msrb.gmra.mxu3 %vm204_vm0, %v368_v13  ;;  %v439_v15 = vsel %vm240_vm1, %v434_v14, 0 }
 0x33b   : > { %448 = vmatpush.bf16.msrb.mxu2 %v439_v15 }
 0x33e   : > { %554 = vmatmul.msk.bf16.vlgmr.msrb.gmra.mxu2 %vm204_vm0, %v432_v16 }
 0x3ad   : > { %v322_v17 = vpop.f32.mrf.mxu3 }
 0x3ae   : > { %v326_v18 = vpack.c.bf16 %v322_v17, %v322_v17 }
 0x3b0   : > { %328 = vrot.lane.b32.xlu2 %v326_v18, %s598_s30 }
 0x3b5   : > { %v324_v19 = vpop.f32.mrf.mxu3 }
 0x3bd   : > { %v386_v20 = vpop.f32.mrf.mxu3 }
 0x3be   : > { %v390_v21 = vpack.c.bf16 %v386_v20, %v386_v20 }
 0x3c0   : > { %392 = vrot.lane.b32.xlu2 %v390_v21, %s599_s4 }
 0x3c1   : > { %v450_v22 = vpop.f32.mrf.mxu2 }
 0x3c2   : > { %v454_v23 = vpack.c.bf16 %v450_v22, %v450_v22 }
 0x3c4   : > { %456 = vrot.lane.b32.xlu0 %v454_v23, %s600_s5 }
 0x3c5   : > { %v388_v24 = vpop.f32.mrf.mxu3 }
 0x3c9   : > { %v452_v25 = vpop.f32.mrf.mxu2 }
 0x40a   : > { %v329_v26 = vpop.permute.xlu2 %328 }
 0x40b   : > { %332 = vst.msk [vmem:[%s666_s29] sm:$0xf] %vm331_vm3, %v329_v26 }
 0x41a   : > { %v393_v27 = vpop.permute.xlu2 %392 }
 0x41b   : > { %396 = vst.msk [vmem:[%s666_s29] sm:$0xf] %vm395_vm4, %v393_v27 }
 0x436   : > { %v457_v28 = vpop.permute.xlu0 %456 }
 0x437   : > { %460 = vst.msk [vmem:[%s666_s29] sm:$0xf] %vm459_vm5, %v457_v28 }
 0x438 PF: > { %s13_s12 = sadd.s32 1, %s593_s12  }
 0x439   : > { %p10_p4 = scmp.ge.s32.totalorder %s13_s12, 4  }
 0x43b   :  { %12 = sbr.rel (!%p10_p4) target bundleno = 1 (0x1), region = 68 }

// kernel: transformer_decoder_layer.7
= control target key start
LH: loop header
LB: loop body
LE: loop exit
PB: predicated region body
PF: predicated region fallthrough
CT: control target
= control target key end

     0   :  { %vm54_vm0 = vcmask 261120   ;;  %vm74_vm1 = vcmask 257024   ;;  %s168_s23 = smov 96   ;;  %s268_s2 = inlined_call_operand.vmem [shape: bf16[32,64], index: 2, kind: input, shape index: {}]   ;;  %s269_s0 = inlined_call_operand.vmem [shape: f32[16,32], index: 0, kind: input, shape index: {}]   ;;  %s270_s1 = inlined_call_operand.vmem [shape: f32[16,32], index: 1, kind: input, shape index: {}]   ;;  %s271_s4 = inlined_call_operand.vmem [shape: bf16[32,32], index: 4, kind: input, shape index: {}]   ;;  %s272_s3 = inlined_call_operand.vmem [shape: f32[1,64], index: 3, kind: input, shape index: {}]   ;;  %s273_s5 = inlined_call_operand.vmem [shape: f32[1,32], index: 5, kind: input, shape index: {}]   ;;  %s274_s6 = inlined_call_operand.vmem [shape: bf16[16,32], index: 6, kind: output, shape index: {0}]   ;;  %s275_s8 = inlined_call_operand.vmem [shape: bf16[16,32], index: 8, kind: output, shape index: {2}]   ;;  %s276_s7 = inlined_call_operand.vmem [shape: bf16[16,32], index: 7, kind: output, shape index: {1}]  }
   0x1   :  { %v162_v0 = vld [vmem:[%s268_s2 + $0x8] sm:$0xff]  ;;  %v27_v1 = vld [vmem:[%s269_s0] sm:$0xff] }
   0x2   :  { %v28_v2 = vld [vmem:[%s269_s0 + $0x8] sm:$0xff]  ;;  %v29_v3 = vld [vmem:[%s270_s1] sm:$0xff]  ;;  %64 = vmatpush.bf16.msra.mxu0 %v162_v0 }
   0x3   :  { %v30_v4 = vld [vmem:[%s270_s1 + $0x8] sm:$0xff]  ;;  %v161_v5 = vld [vmem:[%s268_s2] sm:$0xff]  ;;  %v31_v6 = vadd.f32 %v29_v3, %v27_v1  ;;  %v89_v11 = vpack.c.bf16 %v28_v2, %v27_v1 }
   0x4   :  { %v32_v7 = vadd.f32 %v30_v4, %v28_v2  ;;  %v164_v8 = vld [vmem:[%s271_s4 + $0x8] sm:$0xff]  ;;  %v163_v9 = vld [vmem:[%s271_s4] sm:$0xff] }
   0x5   :  { %119 = vmatpush.bf16.msra.mxu1 %v164_v8  ;;  %v166_v12 = vld [vmem:[%s272_s3] ss:$0 sm:$0xff] }
   0x6   :  { %v33_v10 = vpack.c.bf16 %v32_v7, %v31_v6  ;;  %65 = vmatpush.bf16.msra.mxu0 %v161_v5  ;;  %v167_v13 = vld [vmem:[%s273_s5] ss:$0 sm:$0xff] }
   0x9   :  { %120 = vmatpush.bf16.msra.mxu1 %v163_v9  ;;  %151 = vmatmul.msk.bf16.vlgmr.msra.gmra.mxu0 %vm54_vm0, %v33_v10 }
   0xc   :  { %160 = vmatmul.msk.bf16.vlgmr.msra.gmra.mxu1 %vm54_vm0, %v89_v11 }
  0x86   :  { %v67_v14 = vpop.f32.mrf.mxu0 }
  0x87   :  { %v68_v15 = vadd.f32 %v166_v12, %v67_v14 }
  0x89   :  { %v122_v16 = vpop.f32.mrf.mxu1  ;;  %v72_v17 = vpack.c.bf16 %v68_v15, %v68_v15 }
  0x8a   :  { %v123_v18 = vadd.f32 %v167_v13, %v122_v16 }
  0x8b   :  { %75 = vst.msk [vmem:[%s274_s6] sm:$0xf] %vm74_vm1, %v72_v17  ;;  %79 = vrot.lane.b32.xlu0 %v72_v17, %s168_s23 }
  0x8c   :  { %v127_v19 = vpack.c.bf16 %v123_v18, %v123_v18 }
  0x8e   :  { %129 = vst.msk [vmem:[%s275_s8] sm:$0xf] %vm74_vm1, %v127_v19  ;;  %v69_v20 = vpop.f32.mrf.mxu0 }
  0x8f   :  { %v70_v21 = vadd.f32 %v166_v12, %v69_v20 }
  0x91   :  { %v124_v22 = vpop.f32.mrf.mxu1  ;;  %v73_v23 = vpack.c.bf16 %v70_v21, %v70_v21 }
  0x92   :  { %v125_v24 = vadd.f32 %v167_v13, %v124_v22 }
  0x93   :  { %76 = vst.msk [vmem:[%s274_s6 + $0x4] sm:$0xf] %vm74_vm1, %v73_v23  ;;  %81 = vrot.lane.b32.xlu0 %v73_v23, %s168_s23 }
  0x94   :  { %v128_v25 = vpack.c.bf16 %v125_v24, %v125_v24 }
  0x96   :  { %130 = vst.msk [vmem:[%s275_s8 + $0x4] sm:$0xf] %vm74_vm1, %v128_v25 }
  0xfd   :  { %v80_v26 = vpop.permute.xlu0 %79 }
  0xfe   :  { %85 = vst.msk [vmem:[%s276_s7] sm:$0xf] %vm74_vm1, %v80_v26 }
 0x105   :  { %v82_v27 = vpop.permute.xlu0 %81 }
 0x106   :  { %86 = vst.msk [vmem:[%s276_s7 + $0x4] sm:$0xf] %vm74_vm1, %v82_v27 }

// kernel: transformer_decoder_layer.9
= control target key start
LH: loop header
LB: loop body
LE: loop exit
PB: predicated region body
PF: predicated region fallthrough
CT: control target
= control target key end

     0   :  { %16 = vsyncpa [#allocation3], 0  ;;  %s449_s0 = inlined_call_operand.vmem [shape: bf16[16,32], index: 0, kind: input, shape index: {}]   ;;  %s450_s1 = inlined_call_operand.vmem [shape: f32[16,32], index: 1, kind: input, shape index: {}]   ;;  %s451_s2 = inlined_call_operand.hbm [shape: bf16[32,32], index: 2, kind: input, shape index: {}]   ;;  %s452_s3 = inlined_call_operand.vmem [shape: f32[1,32], index: 3, kind: input, shape index: {}]   ;;  %s453_s4 = inlined_call_operand.vmem [shape: f32[1,32], index: 4, kind: input, shape index: {}]   ;;  %s454_s5 = inlined_call_operand.vmem [shape: f32[1,32], index: 5, kind: input, shape index: {}]   ;;  %s455_s6 = inlined_call_operand.vmem [shape: f32[16,32], index: 6, kind: input, shape index: {}]   ;;  %s456_s7 = inlined_call_operand.hbm [shape: bf16[32,32], index: 7, kind: input, shape index: {}]   ;;  %s457_s8 = inlined_call_operand.vmem [shape: f32[1,32], index: 8, kind: input, shape index: {}]   ;;  %s458_s9 = inlined_call_operand.vmem [shape: bf16[16,32], index: 9, kind: output, shape index: {0}]   ;;  %s459_s10 = inlined_call_operand.vmem [shape: bf16[16,32], index: 10, kind: output, shape index: {1}]  }
   0x1   :  { %s26_s15 = sshll.u32 %s451_s2, 4  ;;  %s27_s15 = int_to_ptr.hbm [resolvable:$true] %s26_s15 }
   0x2   :  { %17 = vsyncpa [#allocation5], 0  ;;  %s334_s16 = smov [#allocation2]   ;;  %s47_s20 = sshll.u32 %s456_s7, 4  ;;  %s48_s20 = int_to_ptr.hbm [resolvable:$true] %s47_s20 }
   0x3   :  { %s28_s17 = sshll.u32 %s334_s16, 4  ;;  %s335_s21 = smov 64   ;;  %s29_s17 = int_to_ptr.vmem [resolvable:$true] %s28_s17 }
   0x4   :  { %s336_s22 = smov 4   ;;  %s337_s23 = smov [#allocation4]  }
   0x5   :  { %34 = dma.hbm_to_vmem [thread:$0]  %s27_s15, 256, %s29_s17, [#allocation3], %s335_s21, %s335_s21, %s336_s22  }
   0x6   :  { %s49_s24 = sshll.u32 %s337_s23, 4  ;;  %s50_s24 = int_to_ptr.vmem [resolvable:$true] %s49_s24 }
   0x7   :  { %55 = dma.hbm_to_vmem [thread:$0]  %s48_s20, 256, %s50_s24, [#allocation5], %s335_s21, %s335_s21, %s336_s22  }
   0x8   :  { %330 = dma.done.wait [#allocation3], 256  }
   0x9   :  { %331 = vsyncadd [#allocation3], 4294967040 }
   0xa   :  { %332 = dma.done.wait [#allocation5], 256  }
   0xb   :  { %333 = vsyncadd [#allocation5], 4294967040  ;;  %v264_v0 = vld [vmem:[#allocation2 + $0x8] sm:$0xff]  ;;  %v263_v1 = vld [vmem:[#allocation2] sm:$0xff]  ;;  %vm94_vm0 = vcmask 261120   ;;  %v338_v14 = vmov 32.0  }
   0xc   :  { %104 = vmatpush.bf16.msra.mxu0 %v264_v0  ;;  %v262_v2 = vld [vmem:[%s449_s0] sm:$0xff]  ;;  %v113_v10 = vld [vmem:[%s450_s1 + $0x8] sm:$0xff]  ;;  %276 = vrcp.f32 %v338_v14  ;;  %v266_v31 = vld [vmem:[#allocation4 + $0x8] sm:$0xff]  ;;  %vm181_vm7 = vcmask 257024  }
   0xd   :  { %v272_v3 = vld [vmem:[%s452_s3] ss:$0 sm:$0xff]  ;;  %218 = vmatpush.bf16.msra.mxu1 %v266_v31  ;;  %v265_v34 = vld [vmem:[#allocation4] sm:$0xff]  ;;  %v185_v62 = vld [vmem:[%s455_s6 + $0x8] sm:$0xff] }
   0xe   :  { %v112_v5 = vld [vmem:[%s450_s1] sm:$0xff] }
   0xf   :  { %v273_v47 = vld [vmem:[%s453_s4] ss:$0 sm:$0xff] }
  0x10   :  { %105 = vmatpush.bf16.msra.mxu0 %v263_v1  ;;  %v274_v51 = vld [vmem:[%s454_s5] ss:$0 sm:$0xff] }
  0x11   :  { %219 = vmatpush.bf16.msra.mxu1 %v265_v34  ;;  %v184_v61 = vld [vmem:[%s455_s6] sm:$0xff] }
  0x12   :  { %v277_v15 = vpop.eup %276 }
  0x13   :  { %252 = vmatmul.msk.bf16.vlgmr.msra.gmra.mxu0 %vm94_vm0, %v262_v2  ;;  %v123_v16 = vmul.f32 32.0, %v277_v15  ;;  %vm127_vm1 = vweird.f32 %v277_v15 }
  0x15   :  { %v124_v17 = vsub.f32 1.0, %v123_v16 }
  0x17   :  { %v125_v18 = vmul.f32 %v277_v15, %v124_v17 }
  0x19   :  { %v126_v19 = vadd.f32 %v277_v15, %v125_v18 }
  0x1b   :  { %v128_v20 = vsel %vm127_vm1, %v277_v15, %v126_v19 }
  0x90   :  { %v107_v4 = vpop.f32.mrf.mxu0 }
  0x91   :  { %v108_v6 = vadd.f32 %v272_v3, %v107_v4  ;;  %v275_v4 = vld [vmem:[%s457_s8] ss:$0 sm:$0xff] }
  0x93   :  { %v114_v7 = vadd.f32 %v112_v5, %v108_v6 }
  0x95   :  { %v116_v8 = vsel %vm94_vm0, %v114_v7, 0.0 }
  0x96   :  { %117 = vadd.xlane.f32.xlu0 %v116_v8 }
  0x98   :  { %v109_v9 = vpop.f32.mrf.mxu0 }
  0x99   :  { %v110_v11 = vadd.f32 %v272_v3, %v109_v9 }
  0x9b   :  { %v115_v12 = vadd.f32 %v113_v10, %v110_v11 }
  0x9d   :  { %v119_v13 = vsel %vm94_vm0, %v115_v12, 0.0 }
  0x9e   :  { %120 = vadd.xlane.f32.xlu0 %v119_v13 }
 0x109   :  { %v118_v21 = vpop.xlane.xlu0 %117 }
 0x10a   :  { %v129_v22 = vmul.f32 %v128_v20, %v118_v21 }
 0x10c   :  { %v131_v23 = vsub.f32 %v114_v7, %v129_v22 }
 0x10e   :  { %v133_v24 = vmul.f32 %v131_v23, %v131_v23 }
 0x110   :  { %v135_v25 = vsel %vm94_vm0, %v133_v24, 0.0 }
 0x111   :  { %136 = vadd.xlane.f32.xlu1 %v135_v25  ;;  %v121_v26 = vpop.xlane.xlu0 %120 }
 0x112   :  { %v130_v27 = vmul.f32 %v128_v20, %v121_v26 }
 0x114   :  { %v132_v28 = vsub.f32 %v115_v12, %v130_v27 }
 0x116   :  { %v134_v29 = vmul.f32 %v132_v28, %v132_v28 }
 0x118   :  { %v138_v30 = vsel %vm94_vm0, %v134_v29, 0.0 }
 0x119   :  { %139 = vadd.xlane.f32.xlu1 %v138_v30 }
 0x184   :  { %v137_v32 = vpop.xlane.xlu1 %136 }
 0x185   :  { %v141_v33 = vmul.f32 %v137_v32, %v128_v20 }
 0x187   :  { %v143_v35 = vadd.f32 1e-05, %v141_v33 }
 0x189   :  { %278 = vrsqrt.f32 %v143_v35  ;;  %vm151_vm3 = vweird.f32 %v143_v35 }
 0x18c   :  { %v140_v36 = vpop.xlane.xlu1 %139 }
 0x18d   :  { %v142_v37 = vmul.f32 %v140_v36, %v128_v20 }
 0x18f   :  { %v279_v38 = vpop.eup %278  ;;  %v144_v39 = vadd.f32 1e-05, %v142_v37 }
 0x190   :  { %v146_v40 = vmul.f32 %v279_v38, %v143_v35  ;;  %vm152_vm2 = vweird.f32 %v279_v38 }
 0x191   :  { %280 = vrsqrt.f32 %v144_v39  ;;  %vm153_vm4 = vmor %vm151_vm3, %vm152_vm2  ;;  %vm161_vm6 = vweird.f32 %v144_v39 }
 0x192   :  { %v147_v41 = vmul.f32 %v279_v38, %v146_v40 }
 0x194   :  { %v148_v42 = vmul.f32 0.5, %v147_v41 }
 0x196   :  { %v149_v43 = vsub.f32 1.5, %v148_v42 }
 0x197   :  { %v281_v44 = vpop.eup %280 }
 0x198   :  { %v150_v45 = vmul.f32 %v279_v38, %v149_v43  ;;  %v156_v46 = vmul.f32 %v281_v44, %v144_v39  ;;  %vm162_vm5 = vweird.f32 %v281_v44 }
 0x199   :  { %vm163_vm8 = vmor %vm161_vm6, %vm162_vm5 }
 0x19a   :  { %v154_v48 = vsel %vm153_vm4, %v279_v38, %v150_v45  ;;  %v157_v49 = vmul.f32 %v281_v44, %v156_v46 }
 0x19b   :  { %v165_v50 = vmul.f32 %v154_v48, %v131_v23 }
 0x19c   :  { %v158_v52 = vmul.f32 0.5, %v157_v49 }
 0x19d   :  { %v171_v53 = vmul.f32 %v273_v47, %v165_v50 }
 0x19e   :  { %v159_v54 = vsub.f32 1.5, %v158_v52 }
 0x19f   :  { %v177_v55 = vadd.f32 %v274_v51, %v171_v53 }
 0x1a0   :  { %v160_v56 = vmul.f32 %v281_v44, %v159_v54 }
 0x1a1   :  { %v179_v57 = vpack.c.bf16 %v177_v55, %v177_v55  ;;  %v186_v1 = vadd.f32 %v184_v61, %v177_v55 }
 0x1a2   :  { %v164_v58 = vsel %vm163_vm8, %v281_v44, %v160_v56 }
 0x1a3   :  { %v166_v59 = vmul.f32 %v164_v58, %v132_v28  ;;  %182 = vst.msk [vmem:[%s458_s9] sm:$0xf] %vm181_vm7, %v179_v57 }
 0x1a5   :  { %v172_v60 = vmul.f32 %v273_v47, %v166_v59 }
 0x1a7   :  { %v178_v63 = vadd.f32 %v274_v51, %v172_v60 }
 0x1a9   :  { %v180_v0 = vpack.c.bf16 %v178_v63, %v178_v63  ;;  %v187_v2 = vadd.f32 %v185_v62, %v178_v63 }
 0x1ab   :  { %v188_v3 = vpack.c.bf16 %v187_v2, %v186_v1  ;;  %183 = vst.msk [vmem:[%s458_s9 + $0x4] sm:$0xf] %vm181_vm7, %v180_v0 }
 0x1ad   :  { %261 = vmatmul.msk.bf16.vlgmr.msra.gmra.mxu1 %vm94_vm0, %v188_v3 }
 0x22a   :  { %v221_v5 = vpop.f32.mrf.mxu1 }
 0x22b   :  { %v222_v6 = vadd.f32 %v275_v4, %v221_v5 }
 0x22d   :  { %v226_v7 = vpack.c.bf16 %v222_v6, %v222_v6 }
 0x22f   :  { %228 = vst.msk [vmem:[%s459_s10] sm:$0xf] %vm181_vm7, %v226_v7 }
 0x232   :  { %v223_v8 = vpop.f32.mrf.mxu1 }
 0x233   :  { %v224_v9 = vadd.f32 %v275_v4, %v223_v8 }
 0x235   :  { %v227_v10 = vpack.c.bf16 %v224_v9, %v224_v9 }
 0x237   :  { %229 = vst.msk [vmem:[%s459_s10 + $0x4] sm:$0xf] %vm181_vm7, %v227_v10 }
 0x238   :  { %238 = vsyncpa [#allocation3], 1 }
 0x239   :  { %239 = vsyncpa [#allocation5], 1 }

// kernel: transformer_decoder_layer.12
= control target key start
LH: loop header
LB: loop body
LE: loop exit
PB: predicated region body
PF: predicated region fallthrough
CT: control target
= control target key end

     0   :  { %11 = vsyncpa [#allocation3], 0  ;;  %s223_s24 = smov [#allocation2]   ;;  %s224_s26 = smov 64   ;;  %s291_s0 = inlined_call_operand.vmem [shape: bf16[16,32], index: 0, kind: input, shape index: {}]   ;;  %s292_s1 = inlined_call_operand.vmem [shape: bf16[16,32], index: 1, kind: input, shape index: {}]   ;;  %s293_s2 = inlined_call_operand.hbm [shape: bf16[32,32], index: 2, kind: input, shape index: {}]   ;;  %s294_s3 = inlined_call_operand.vmem [shape: f32[1,32], index: 3, kind: input, shape index: {}]   ;;  %s295_s4 = inlined_call_operand.vmem [shape: f32[1,32], index: 4, kind: input, shape index: {}]   ;;  %s296_s5 = inlined_call_operand.vmem [shape: f32[1,32], index: 5, kind: input, shape index: {}]   ;;  %s297_s6 = inlined_call_operand.vmem [shape: bf16[16,32], index: 6, kind: output, shape index: {}]  }
   0x1   :  { %s20_s23 = sshll.u32 %s293_s2, 4  ;;  %s22_s25 = sshll.u32 %s223_s24, 4  ;;  %s21_s23 = int_to_ptr.hbm [resolvable:$true] %s20_s23  ;;  %s23_s25 = int_to_ptr.vmem [resolvable:$true] %s22_s25 }
   0x2   :  { %s225_s27 = smov 4  }
   0x3   :  { %28 = dma.hbm_to_vmem [thread:$0]  %s21_s23, 256, %s23_s25, [#allocation3], %s224_s26, %s224_s26, %s225_s27  }
   0x4   :  { %221 = dma.done.wait [#allocation3], 256  }
   0x5   :  { %222 = vsyncadd [#allocation3], 4294967040  ;;  %v179_v0 = vld [vmem:[#allocation2 + $0x8] sm:$0xff]  ;;  %v178_v1 = vld [vmem:[#allocation2] sm:$0xff]  ;;  %vm67_vm0 = vcmask 261120   ;;  %v226_v15 = vmov 32.0  }
   0x6   :  { %77 = vmatpush.bf16.msra.mxu0 %v179_v0  ;;  %v177_v2 = vld [vmem:[%s291_s0] sm:$0xff]  ;;  %191 = vrcp.f32 %v226_v15  ;;  %vm156_vm6 = vcmask 257024  }
   0x7   :  { %v181_v3 = vld [vmem:[%s292_s1] sm:$0xff]  }
   0x8   :  { %v188_v4 = vld [vmem:[%s294_s3] ss:$0 sm:$0xff]  ;;  %v182_v5 = vunpack.c.l.bf16 %v181_v3  ;;  %v183_v10 = vunpack.c.h.bf16 %v181_v3 }
   0x9   :  { %v189_v46 = vld [vmem:[%s295_s4] ss:$0 sm:$0xff] }
   0xa   :  { %78 = vmatpush.bf16.msra.mxu0 %v178_v1  ;;  %v190_v49 = vld [vmem:[%s296_s5] ss:$0 sm:$0xff] }
   0xc   :  { %v192_v16 = vpop.eup %191 }
   0xd   :  { %176 = vmatmul.msk.bf16.vlgmr.msra.gmra.mxu0 %vm67_vm0, %v177_v2  ;;  %v98_v17 = vmul.f32 32.0, %v192_v16  ;;  %vm102_vm1 = vweird.f32 %v192_v16 }
   0xf   :  { %v99_v18 = vsub.f32 1.0, %v98_v17 }
  0x11   :  { %v100_v19 = vmul.f32 %v192_v16, %v99_v18 }
  0x13   :  { %v101_v20 = vadd.f32 %v192_v16, %v100_v19 }
  0x15   :  { %v103_v21 = vsel %vm102_vm1, %v192_v16, %v101_v20 }
  0x8a   :  { %v80_v6 = vpop.f32.mrf.mxu0 }
  0x8b   :  { %v81_v7 = vadd.f32 %v188_v4, %v80_v6 }
  0x8d   :  { %v89_v8 = vadd.f32 %v182_v5, %v81_v7 }
  0x8f   :  { %v91_v9 = vsel %vm67_vm0, %v89_v8, 0.0 }
  0x90   :  { %92 = vadd.xlane.f32.xlu0 %v91_v9 }
  0x92   :  { %v82_v11 = vpop.f32.mrf.mxu0 }
  0x93   :  { %v83_v12 = vadd.f32 %v188_v4, %v82_v11 }
  0x95   :  { %v90_v13 = vadd.f32 %v183_v10, %v83_v12 }
  0x97   :  { %v94_v14 = vsel %vm67_vm0, %v90_v13, 0.0 }
  0x98   :  { %95 = vadd.xlane.f32.xlu0 %v94_v14 }
 0x103   :  { %v93_v22 = vpop.xlane.xlu0 %92 }
 0x104   :  { %v104_v23 = vmul.f32 %v103_v21, %v93_v22 }
 0x106   :  { %v106_v24 = vsub.f32 %v89_v8, %v104_v23 }
 0x108   :  { %v108_v25 = vmul.f32 %v106_v24, %v106_v24 }
 0x10a   :  { %v110_v26 = vsel %vm67_vm0, %v108_v25, 0.0 }
 0x10b   :  { %111 = vadd.xlane.f32.xlu1 %v110_v26  ;;  %v96_v27 = vpop.xlane.xlu0 %95 }
 0x10c   :  { %v105_v28 = vmul.f32 %v103_v21, %v96_v27 }
 0x10e   :  { %v107_v29 = vsub.f32 %v90_v13, %v105_v28 }
 0x110   :  { %v109_v30 = vmul.f32 %v107_v29, %v107_v29 }
 0x112   :  { %v113_v31 = vsel %vm67_vm0, %v109_v30, 0.0 }
 0x113   :  { %114 = vadd.xlane.f32.xlu1 %v113_v31 }
 0x17e   :  { %v112_v32 = vpop.xlane.xlu1 %111 }
 0x17f   :  { %v116_v33 = vmul.f32 %v112_v32, %v103_v21 }
 0x181   :  { %v118_v34 = vadd.f32 1e-05, %v116_v33 }
 0x183   :  { %193 = vrsqrt.f32 %v118_v34  ;;  %vm126_vm3 = vweird.f32 %v118_v34 }
 0x186   :  { %v115_v35 = vpop.xlane.xlu1 %114 }
 0x187   :  { %v117_v36 = vmul.f32 %v115_v35, %v103_v21 }
 0x189   :  { %v194_v37 = vpop.eup %193  ;;  %v119_v38 = vadd.f32 1e-05, %v117_v36 }
 0x18a   :  { %v121_v39 = vmul.f32 %v194_v37, %v118_v34  ;;  %vm127_vm2 = vweird.f32 %v194_v37 }
 0x18b   :  { %195 = vrsqrt.f32 %v119_v38  ;;  %vm128_vm4 = vmor %vm126_vm3, %vm127_vm2  ;;  %vm136_vm7 = vweird.f32 %v119_v38 }
 0x18c   :  { %v122_v40 = vmul.f32 %v194_v37, %v121_v39 }
 0x18e   :  { %v123_v41 = vmul.f32 0.5, %v122_v40 }
 0x190   :  { %v124_v42 = vsub.f32 1.5, %v123_v41 }
 0x191   :  { %v196_v43 = vpop.eup %195 }
 0x192   :  { %v125_v44 = vmul.f32 %v194_v37, %v124_v42  ;;  %v131_v45 = vmul.f32 %v196_v43, %v119_v38  ;;  %vm137_vm5 = vweird.f32 %v196_v43 }
 0x193   :  { %vm138_vm8 = vmor %vm136_vm7, %vm137_vm5 }
 0x194   :  { %v129_v47 = vsel %vm128_vm4, %v194_v37, %v125_v44  ;;  %v132_v48 = vmul.f32 %v196_v43, %v131_v45 }
 0x195   :  { %v140_v50 = vmul.f32 %v129_v47, %v106_v24 }
 0x196   :  { %v133_v51 = vmul.f32 0.5, %v132_v48 }
 0x197   :  { %v146_v52 = vmul.f32 %v189_v46, %v140_v50 }
 0x198   :  { %v134_v53 = vsub.f32 1.5, %v133_v51 }
 0x199   :  { %v152_v54 = vadd.f32 %v190_v49, %v146_v52 }
 0x19a   :  { %v135_v55 = vmul.f32 %v196_v43, %v134_v53 }
 0x19b   :  { %v154_v56 = vpack.c.bf16 %v152_v54, %v152_v54 }
 0x19c   :  { %v139_v57 = vsel %vm138_vm8, %v196_v43, %v135_v55 }
 0x19d   :  { %157 = vst.msk [vmem:[%s297_s6] sm:$0xf] %vm156_vm6, %v154_v56  ;;  %v141_v58 = vmul.f32 %v139_v57, %v107_v29 }
 0x19f   :  { %v147_v59 = vmul.f32 %v189_v46, %v141_v58 }
 0x1a1   :  { %v153_v60 = vadd.f32 %v190_v49, %v147_v59 }
 0x1a3   :  { %v155_v61 = vpack.c.bf16 %v153_v60, %v153_v60 }
 0x1a5   :  { %158 = vst.msk [vmem:[%s297_s6 + $0x4] sm:$0xf] %vm156_vm6, %v155_v61 }
 0x1a6   :  { %163 = vsyncpa [#allocation3], 1 }

// kernel: transformer_decoder_layer.11
= control target key start
LH: loop header
LB: loop body
LE: loop exit
PB: predicated region body
PF: predicated region fallthrough
CT: control target
= control target key end

     0   :  { %s1145_s0 = inlined_call_operand.vmem [shape: bf16[2,8,32], index: 0, kind: input, shape index: {}]   ;;  %s1146_s1 = inlined_call_operand.vmem [shape: bf16[2,8,32], index: 1, kind: input, shape index: {}]   ;;  %s1147_s2 = inlined_call_operand.vmem [shape: bf16[2,8,32], index: 2, kind: input, shape index: {}]   ;;  %s1148_s3 = inlined_call_operand.vmem [shape: bf16[2,8,32], index: 3, kind: output, shape index: {0}]   ;;  %s1149_s4 = inlined_call_operand.hbm [shape: f32[2,4,8,8], index: 4, kind: output, shape index: {1}]   ;;  %s1150_s5 = inlined_call_operand.hbm [shape: f32[2,8,8], index: 5, kind: output, shape index: {2}]  }
   0x1   :  { %1151 = sst [smem:[#allocation8_spill]] %s1145_s0 }
   0x2   :  { %1152 = sst [smem:[#allocation9_spill]] %s1146_s1 }
   0x3   :  { %11 = vsyncpa [#allocation3], 0 }
   0x4   :  { %13 = vsyncpa [#allocation3 + $0x1], 0 }
   0x5   :  { %14 = vsyncpa [#allocation5], 0 }
   0x6   :  { %16 = vsyncpa [#allocation5 + $0x1], 0  ;;  %s962_s18 = smov 0   ;;  %s964_s19 = smov 0  }
   0x7   :  { %s966_s20 = smov 0   ;;  %s968_s21 = smov 0  }
   0x8 LB: > { %s983_s22 = sadd.s32 4294967295, %s923_s21   ;;  %s733_s23 = sadd.s32 4294967294, %s923_s21   ;;  %s923_s21 = sphi %s968_s21, %s1160_s21   ;;  %s919_s20 = sphi %s966_s20, %s1159_s20   ;;  %s915_s19 = sphi %s964_s19, %s1158_s19   ;;  %s911_s18 = sphi %s962_s18, %s1157_s18  }
   0x9   : > { %s987_s24 = sadd.s32 1, %s923_s21   ;;  %s133_s25 = sadd.s32 1, %s919_s20 }
   0xa   : > { %s130_s26 = ssub.s32 %s923_s21, %s987_s24  ;;  %p143_p0 = scmp.ne.s32.totalorder %s919_s20, %s915_s19 }
   0xb   : > { %p131_p1 = scmp.eq.s32.totalorder %s130_s26, 0  ;;  %p144_p2 = scmp.eq.s32.totalorder %s983_s22, 1 }
   0xc   : > { %p149_p3 = scmp.ne.s32.totalorder %s915_s19, %s911_s18  ;;  %p150_p4 = scmp.eq.s32.totalorder %s733_s23, 1 }
   0xd   : > { %s998_s27 = scalar_select %p131_p1, %s919_s20, %s133_s25  }
   0xe   : > { %p1000_p5 = por %p144_p2, %p143_p0  ;;  %p1004_p6 = por %p150_p4, %p149_p3 }
   0xf   : > { %p736_p7 = scmp.ge.s32.totalorder %s923_s21, 1  ;;  %p215_p8 = scmp.lt.s32.totalorder %s923_s21, 3 }
  0x11   : > { %p216_p9 = pnand %p736_p7, %p215_p8 }
  0x12   : > { %p259_p10 = scmp.lt.s32.totalorder (!%p216_p9), %s983_s22, 1  ;;  %s1155_s1 = sld [smem:[#allocation9_spill]] (!%p216_p9) }
  0x13   : > { %219 = sbr.rel (%p216_p9) target bundleno = 1098 (0x44a), region = 32  ;;  %s1156_s0 = sld [smem:[#allocation8_spill]] (!%p216_p9) }
  0x14   : > { %s925_s13 = smov (!%p216_p9), 112   ;;  %s926_s14 = smov (!%p216_p9), 104  }
  0x15   : > { %s927_s15 = smov (!%p216_p9), 120   ;;  %s1042_s25 = sand.u32 (!%p216_p9), 1, %s915_s19  }
  0x16   : > { %s737_s26 = sshll.u32 (!%p216_p9), %s1042_s25, 5  ;;  %s928_s11 = smov (!%p216_p9), 8  }
  0x18   : > { %s260_s30 = scalar_select %p259_p10, %s983_s22, 1  ;;  %vm279_vm0 = vcmask 64512   ;;  %vm315_vm1 = vcmask 1043456   ;;  %vm333_vm2 = vcmask 60416  }
  0x1a   : > { %s1012_s6 = sshll.u32 %s260_s30, 2  ;;  %s1047_s30 = scalar_lea.vmem [#allocation2], %s737_s26 }
  0x1b   : > { %s266_s9 = scalar_lea.vmem %s1155_s1, %s1012_s6  ;;  %s262_s12 = scalar_lea.vmem %s1156_s0, %s1012_s6 }
  0x1c   : > { %v277_v0 = vld [vmem:[%s266_s9] sm:$0xf]  ;;  %s270_s23 = scalar_lea.vmem %s1147_s2, %s1012_s6  ;;  %s1062_s9 = scalar_lea.vmem %s1148_s3, %s1012_s6 }
  0x1d   : > { %v284_v1 = vsel %vm279_vm0, %v277_v0, 0  ;;  %v276_v2 = vld [vmem:[%s262_s12] sm:$0xf]  ;;  %v342_v3 = vunpack.c.l.b16 %v277_v0  ;;  %s738_s6 = sshll.u32 %s1042_s25, 3  ;;  %s761_s12 = sshll.u32 %s983_s22, 5 }
  0x1e   : > { %293 = vmatpush.bf16.xpose.msra.mxu0 %v284_v1  ;;  %v337_v5 = vunpack.c.l.b16 %v276_v2  ;;  %v278_v21 = vld [vmem:[%s270_s23] sm:$0xf]  ;;  %s1084_s10 = scalar_lea.vmem [#allocation4], %s738_s6  ;;  %s572_s16 = scalar_lea.hbm %s1149_s4, %s761_s12 }
  0x1f   : > { %v343_v4 = vpack.c.b16 %v342_v3, %v342_v3  ;;  %v317_v22 = vsel %vm315_vm1, %v278_v21, 0  ;;  %v379_v46 = vunpack.c.l.b16 %v278_v21  ;;  %s573_s7 = sshll.u32 %s1047_s30, 4  ;;  %s575_s8 = sshll.u32 %s572_s16, 4  ;;  %s574_s7 = int_to_ptr.vmem [resolvable:$true] %s573_s7  ;;  %s576_s8 = int_to_ptr.hbm [resolvable:$true] %s575_s8 }
  0x20   : > { %v338_v6 = vpack.c.b16 %v337_v5, %v337_v5  ;;  %326 = vmatpush.bf16.msra.mxu1 %v317_v22  ;;  %s553_s6 = scalar_lea.sflag [#allocation3], %s1042_s25  ;;  %s843_s0 = sshra.s32 %s576_s8, 4  ;;  %s844_s0 = int_to_ptr.hbm [resolvable:$true] %s843_s0 }
  0x21   : > { %414 = vrot.lane.b32.xlu2 %v343_v4, %s925_s13  ;;  %v380_v47 = vpack.c.b16 %v379_v46, %v379_v46  ;;  %s845_s1 = scalar_lea.hbm %s844_s0, 32  ;;  %s849_s12 = scalar_lea.hbm %s1149_s4, 64 }
  0x22   : > { %p846_p11 = scmp.ne.s32.totalorder %s844_s0, %s845_s1  ;;  %p850_p0 = scmp.lt.s32.totalorder %s844_s0, %s1149_s4 }
  0x23   : > { %p851_p1 = scmp.lt.s32.totalorder %s849_s12, %s845_s1 }
  0x24   : > { %p847_p12 = pnand %p846_p11, %p1000_p5 }
  0x25   : > { %743 = vmatmul.msk.bf16.vlgmr.msra.gmra.mxu0 %vm279_vm0, %v276_v2  ;;  %p852_p2 = por %p851_p1, %p850_p0 }
  0x26   : > { %p848_p13 = pneg %p847_p12 }
  0x28   : > { %p853_p3 = pnand %p852_p2, %p848_p13 }
  0x29   : > { %481 = vrot.lane.b32.xlu2 %v343_v4, %s926_s14 }
  0x31   : > { %412 = vrot.lane.b32.xlu2 %v338_v6, %s925_s13 }
  0x39   : > { %479 = vrot.lane.b32.xlu2 %v338_v6, %s926_s14 }
  0x7b   : > { %v415_v11 = vpop.permute.xlu2 %414 }
  0x7c   : > { %v420_v23 = vsel %vm279_vm0, %v415_v11, 0 }
  0x7d   : > { %429 = vmatpush.bf16.xpose.msrb.mxu1 %v420_v23 }
  0x83   : > { %v482_v12 = vpop.permute.xlu2 %481 }
  0x84   : > { %v487_v17 = vsel %vm279_vm0, %v482_v12, 0 }
  0x85   : > { %496 = vmatpush.bf16.xpose.msrb.mxu0 %v487_v17 }
  0x8b   : > { %v413_v16 = vpop.permute.xlu2 %412 }
  0x93   : > { %v480_v20 = vpop.permute.xlu2 %479 }
  0x94   : > { %751 = vmatmul.msk.bf16.vlgmr.msrb.gmra.mxu0 %vm279_vm0, %v480_v20 }
  0xa2   : > { %v295_v7 = vpop.f32.mrf.mxu0 }
  0xa3   : > { %v299_v8 = vmul.f32 0.35355338, %v295_v7 }
  0xa5   : > { %v300_v9 = vsel %vm279_vm0, %v299_v8, -inf }
  0xa6   : > { %301 = vmax.xlane.f32.xlu0 %v300_v9 }
  0xaa   : > { %v297_v10 = vpop.f32.mrf.mxu0 }
  0xba   : > { %344 = vrot.lane.b32.xlu0 %v343_v4, %s927_s15 }
 0x111   : > { %v498_v30 = vpop.f32.mrf.mxu0 }
 0x112   : > { %v502_v31 = vmul.f32 0.35355338, %v498_v30 }
 0x114   : > { %v503_v32 = vsel %vm279_vm0, %v502_v31, -inf }
 0x119   : > { %v302_v13 = vpop.xlane.xlu0 %301  ;;  %v500_v33 = vpop.f32.mrf.mxu0 }
 0x11a   : > { %v303_v14 = vsub.f32 %v299_v8, %v302_v13 }
 0x11c   : > { %v304_v15 = vmul.f32 1.442695, %v303_v14 }
 0x11e   : > { %813 = vpow2.f32 %v304_v15 }
 0x124   : > { %v814_v18 = vpop.eup %813 }
 0x125   : > { %v306_v19 = vsel %vm279_vm0, %v814_v18, 0.0 }
 0x126   : > { %307 = vadd.xlane.f32.xlu1 %v306_v19 }
 0x12c   : > { %v345_v24 = vpop.permute.xlu0 %344 }
 0x12d   : > { %v350_v25 = vsel %vm279_vm0, %v345_v24, 0 }
 0x12e   : > { %359 = vmatpush.bf16.xpose.msra.mxu2 %v350_v25 }
 0x13f   : > { %339 = vrot.lane.b32.xlu1 %v338_v6, %s927_s15 }
 0x169   : > { %504 = vmax.xlane.f32.xlu1 %v503_v32 }
 0x199   : > { %v308_v26 = vpop.xlane.xlu1 %307 }
 0x19a   : > { %815 = vrcp.f32 %v308_v26 }
 0x1a0   : > { %v816_v27 = vpop.eup %815 }
 0x1a1   : > { %v1045_v28 = vmul.f32 %v816_v27, %v814_v18 }
 0x1a3   : > { %335 = vst.msk [vmem:[%s1047_s30] sm:$0xff] %vm279_vm0, %v1045_v28  ;;  %v311_v29 = vpack.c.bf16 %v1045_v28, %v1045_v28 }
 0x1a5   : > { %744 = vmatmul.msk.bf16.vlgmr.msra.gmra.mxu1 %vm279_vm0, %v311_v29 }
 0x1b1   : > { %v340_v34 = vpop.permute.xlu1 %339 }
 0x1b2   : > { %745 = vmatmul.msk.bf16.vlgmr.msra.gmra.mxu2 %vm279_vm0, %v340_v34 }
 0x1b5   : > { %748 = vmatmul.msk.bf16.vlgmr.msrb.gmra.mxu1 %vm279_vm0, %v413_v16 }
 0x1dc   : > { %v505_v50 = vpop.xlane.xlu1 %504 }
 0x1dd   : > { %v506_v54 = vsub.f32 %v502_v31, %v505_v50 }
 0x1df   : > { %v507_v56 = vmul.f32 1.442695, %v506_v54 }
 0x222   : > { %v328_v35 = vpop.f32.mrf.mxu1 }
 0x223   : > { %v332_v36 = vpack.c.bf16 %v328_v35, %v328_v35 }
 0x225   : > { %334 = vst.msk [vmem:[%s1062_s9] sm:$0xf] %vm333_vm2, %v332_v36 }
 0x22a   : > { %v330_v37 = vpop.f32.mrf.mxu1 }
 0x232   : > { %v431_v38 = vpop.f32.mrf.mxu1 }
 0x233   : > { %v435_v39 = vmul.f32 0.35355338, %v431_v38 }
 0x235   : > { %v361_v40 = vpop.f32.mrf.mxu2  ;;  %v436_v41 = vsel %vm279_vm0, %v435_v39, -inf }
 0x236   : > { %v365_v42 = vmul.f32 0.35355338, %v361_v40  ;;  %437 = vmax.xlane.f32.xlu2 %v436_v41 }
 0x238   : > { %v366_v43 = vsel %vm279_vm0, %v365_v42, -inf }
 0x239   : > { %367 = vmax.xlane.f32.xlu0 %v366_v43 }
 0x23a   : > { %v433_v44 = vpop.f32.mrf.mxu1 }
 0x23d   : > { %v363_v45 = vpop.f32.mrf.mxu2 }
 0x24e   : > { %381 = vrot.lane.b32.xlu2 %v380_v47, %s927_s15 }
 0x2a9   : > { %v438_v48 = vpop.xlane.xlu2 %437 }
 0x2aa   : > { %v439_v49 = vsub.f32 %v435_v39, %v438_v48 }
 0x2ac   : > { %v440_v51 = vmul.f32 1.442695, %v439_v49  ;;  %v368_v52 = vpop.xlane.xlu0 %367 }
 0x2ad   : > { %v369_v53 = vsub.f32 %v365_v42, %v368_v52 }
 0x2ae   : > { %817 = vpow2.f32 %v440_v51 }
 0x2af   : > { %v370_v55 = vmul.f32 1.442695, %v369_v53 }
 0x2b1   : > { %819 = vpow2.f32 %v370_v55  ;;  %v382_v63 = vpop.permute.xlu2 %381 }
 0x2b2   : > { %821 = vpow2.f32 %v507_v56  ;;  %v387_v0 = vsel %vm315_vm1, %v382_v63, 0 }
 0x2b3   : > { %396 = vmatpush.bf16.msra.mxu3 %v387_v0 }
 0x2b4   : > { %v818_v57 = vpop.eup %817 }
 0x2b5   : > { %v442_v58 = vsel %vm279_vm0, %v818_v57, 0.0 }
 0x2b6   : > { %443 = vadd.xlane.f32.xlu1 %v442_v58 }
 0x2b7   : > { %v820_v59 = vpop.eup %819 }
 0x2b8   : > { %v372_v60 = vsel %vm279_vm0, %v820_v59, 0.0  ;;  %v822_v61 = vpop.eup %821 }
 0x2b9   : > { %373 = vadd.xlane.f32.xlu0 %v372_v60  ;;  %v509_v62 = vsel %vm279_vm0, %v822_v61, 0.0 }
 0x2c1   : > { %510 = vadd.xlane.f32.xlu0 %v509_v62 }
 0x2cf   : > { %448 = vrot.lane.b32.xlu1 %v380_v47, %s925_s13  ;;  %s758_s13 = sshll.u32 %s983_s22, 3 }
 0x2d0   : > { %s588_s26 = scalar_lea.hbm %s1150_s5, %s758_s13 }
 0x2d5   : > { %515 = vrot.lane.b32.xlu0 %v380_v47, %s926_s14 }
 0x329   : > { %v444_v1 = vpop.xlane.xlu1 %443 }
 0x32a   : > { %823 = vrcp.f32 %v444_v1 }
 0x32c   : > { %v374_v2 = vpop.xlane.xlu0 %373 }
 0x32d   : > { %825 = vrcp.f32 %v374_v2 }
 0x330   : > { %v824_v3 = vpop.eup %823 }
 0x331   : > { %v446_v4 = vmul.f32 %v824_v3, %v818_v57 }
 0x333   : > { %v826_v5 = vpop.eup %825  ;;  %750 = vst.msk [vmem:[%s1047_s30 + $0x10] sm:$0xff] %vm279_vm0, %v446_v4  ;;  %v447_v17 = vpack.c.bf16 %v446_v4, %v446_v4 }
 0x334   : > { %v376_v6 = vmul.f32 %v826_v5, %v820_v59  ;;  %v511_v7 = vpop.xlane.xlu0 %510 }
 0x335   : > { %827 = vrcp.f32 %v511_v7 }
 0x336   : > { %747 = vst.msk [vmem:[%s1047_s30 + $0x8] sm:$0xff] %vm279_vm0, %v376_v6  ;;  %v377_v8 = vpack.c.bf16 %v376_v6, %v376_v6  ;;  %v411_v9 = vadd.f32 %v376_v6, %v1045_v28 }
 0x338   : > { %746 = vmatmul.msk.bf16.vlgmr.msra.gmra.mxu3 %vm279_vm0, %v377_v8  ;;  %v478_v12 = vadd.f32 %v446_v4, %v411_v9 }
 0x33b   : > { %v828_v10 = vpop.eup %827 }
 0x33c   : > { %v513_v11 = vmul.f32 %v828_v10, %v822_v61 }
 0x33e   : > { %753 = vst.msk [vmem:[%s1047_s30 + $0x18] sm:$0xff] %vm279_vm0, %v513_v11  ;;  %v545_v13 = vadd.f32 %v513_v11, %v478_v12  ;;  %v514_v20 = vpack.c.bf16 %v513_v11, %v513_v11 }
 0x340   : > { %v546_v14 = vmul.f32 0.25, %v545_v13 }
 0x341   : > { %v449_v15 = vpop.permute.xlu1 %448 }
 0x342   : > { %v454_v16 = vsel %vm315_vm1, %v449_v15, 0  ;;  %547 = vst.msk [vmem:[%s1084_s10] sm:$0xff] %vm279_vm0, %v546_v14 }
 0x343   : > { %463 = vmatpush.bf16.msrb.mxu3 %v454_v16 }
 0x347   : > { %v516_v18 = vpop.permute.xlu0 %515 }
 0x348   : > { %749 = vmatmul.msk.bf16.vlgmr.msrb.gmra.mxu3 %vm279_vm0, %v447_v17  ;;  %v521_v19 = vsel %vm315_vm1, %v516_v18, 0 }
 0x349   : > { %530 = vmatpush.bf16.msrb.mxu2 %v521_v19 }
 0x34c   : > { %752 = vmatmul.msk.bf16.vlgmr.msrb.gmra.mxu2 %vm279_vm0, %v514_v20 }
 0x3bb   : > { %v398_v21 = vpop.f32.mrf.mxu3 }
 0x3bc   : > { %v402_v22 = vpack.c.bf16 %v398_v21, %v398_v21 }
 0x3be   : > { %404 = vrot.lane.b32.xlu2 %v402_v22, %s928_s11 }
 0x3c3   : > { %v400_v23 = vpop.f32.mrf.mxu3 }
 0x3c4   : > { %856 = shalt.err (!%p853_p3)
}
 0x3c5   : > { %s929_s30 = smov 128   ;;  %s590_s13 = sshll.u32 %s1084_s10, 4  ;;  %s591_s13 = int_to_ptr.vmem [resolvable:$true] %s590_s13 }
 0x3c6   : > { %762 = dma.vmem_to_hbm [thread:$0]  (%p1000_p5), %s574_s7, 512, %s576_s8, %s553_s6, %s929_s30, %s929_s30, %s928_s11  }
 0x3c7   : > { %s592_s16 = sshll.u32 %s588_s26, 4  ;;  %s558_s23 = scalar_lea.sflag [#allocation5], %s1042_s25  ;;  %s593_s16 = int_to_ptr.hbm [resolvable:$true] %s592_s16 }
 0x3c8   : > { %s871_s22 = sshra.s32 %s593_s16, 4  ;;  %s877_s12 = scalar_lea.hbm %s1150_s5, 16  ;;  %s872_s22 = int_to_ptr.hbm [resolvable:$true] %s871_s22 }
 0x3c9   : > { %s873_s0 = scalar_lea.hbm %s872_s22, 8  ;;  %p878_p9 = scmp.lt.s32.totalorder %s872_s22, %s1150_s5 }
 0x3ca   : > { %p874_p4 = scmp.ne.s32.totalorder %s872_s22, %s873_s0  ;;  %p879_p10 = scmp.lt.s32.totalorder %s877_s12, %s873_s0 }
 0x3cc   : > { %p875_p7 = pnand %p874_p4, %p1000_p5  ;;  %p880_p11 = por %p879_p10, %p878_p9 }
 0x3ce   : > { %p876_p8 = pneg %p875_p7 }
 0x3d0   : > { %p881_p12 = pnand %p880_p11, %p876_p8 }
 0x3d2   : > { %884 = shalt.err (!%p881_p12)
}
 0x3d3   : > { %763 = dma.vmem_to_hbm [thread:$0]  (%p1000_p5), %s591_s13, 128, %s593_s16, %s558_s23   ;;  %v465_v24 = vpop.f32.mrf.mxu3  ;;  %v532_v26 = vpop.f32.mrf.mxu2  ;;  %vm407_vm3 = vcmask 126016   ;;  %vm474_vm4 = vcmask 191616   ;;  %vm541_vm5 = vcmask 257216  }
 0x3d4   : > { %v469_v25 = vpack.c.bf16 %v465_v24, %v465_v24  ;;  %s930_s25 = smov 16   ;;  %v536_v27 = vpack.c.bf16 %v532_v26, %v532_v26  ;;  %s931_s10 = smov 24  }
 0x3d6   : > { %471 = vrot.lane.b32.xlu2 %v469_v25, %s930_s25  ;;  %538 = vrot.lane.b32.xlu0 %v536_v27, %s931_s10 }
 0x3db   : > { %v467_v28 = vpop.f32.mrf.mxu3  ;;  %v534_v29 = vpop.f32.mrf.mxu2 }
 0x418   : > { %v405_v30 = vpop.permute.xlu2 %404 }
 0x419   : > { %408 = vst.msk [vmem:[%s1062_s9] sm:$0xf] %vm407_vm3, %v405_v30 }
 0x430   : > { %v472_v31 = vpop.permute.xlu2 %471 }
 0x431   : > { %475 = vst.msk [vmem:[%s1062_s9] sm:$0xf] %vm474_vm4, %v472_v31 }
 0x448   : > { %v539_v32 = vpop.permute.xlu0 %538 }
 0x449   : > { %542 = vst.msk [vmem:[%s1062_s9] sm:$0xf] %vm541_vm5, %v539_v32 }
 0x44a PF: > { %p773_p5 = scmp.ge.s32.totalorder %s923_s21, 2  ;;  %s611_s28 = sand.u32 1, %s911_s18  }
 0x44b   : > { %s612_s11 = scalar_lea.sflag [#allocation3], %s611_s28 }
 0x44c   : > { %p767_p13 = pnand %p773_p5, %p1004_p6 }
 0x44e   : > { %p768_p0 = pneg %p767_p13 }
 0x450   : > { %902 = dma.done.wait (%p768_p0), %s612_s11, 512  }
 0x451   : > { %904 = vsyncadd (%p768_p0), %s612_s11, 4294966784  ;;  %s622_s26 = scalar_lea.sflag [#allocation5], %s611_s28 }
 0x452   : > { %906 = dma.done.wait (%p768_p0), %s622_s26, 128  }
 0x453   : > { %908 = vsyncadd (%p768_p0), %s622_s26, 4294967168  ;;  %p19_p1 = scmp.ge.s32.totalorder %s987_s24, 4   ;;  %s1157_s18 = smov %s915_s19 }
 0x454   : > { %s1158_s19 = smov %s919_s20  ;;  %s1159_s20 = smov %s998_s27 }
 0x455   : > { %s1160_s21 = smov %s987_s24  ;;  %21 = sbr.rel (!%p19_p1) target bundleno = 8 (0x8), region = 105 }
 0x45a   :  { %628 = vsyncpa [#allocation3], 1 }
 0x45b   :  { %630 = vsyncpa [#allocation3 + $0x1], 1 }
 0x45c   :  { %631 = vsyncpa [#allocation5], 1 }
 0x45d   :  { %633 = vsyncpa [#allocation5 + $0x1], 1 }

// kernel: transformer_decoder_layer.13
= control target key start
LH: loop header
LB: loop body
LE: loop exit
PB: predicated region body
PF: predicated region fallthrough
CT: control target
= control target key end

     0   :  { %vm31_vm0 = vcmask 261120   ;;  %v271_v7 = vmov 0.0   ;;  %vm116_vm1 = vcmask 523264   ;;  %v272_v34 = vmov 32.0   ;;  %s366_s1 = inlined_call_operand.vmem [shape: bf16[32,64], index: 1, kind: input, shape index: {}]   ;;  %s367_s2 = inlined_call_operand.vmem [shape: f32[1,64], index: 2, kind: input, shape index: {}]   ;;  %s368_s0 = inlined_call_operand.vmem [shape: bf16[16,32], index: 0, kind: input, shape index: {}]   ;;  %s369_s3 = inlined_call_operand.vmem [shape: bf16[64,32], index: 3, kind: input, shape index: {}]   ;;  %s370_s4 = inlined_call_operand.vmem [shape: f32[1,32], index: 4, kind: input, shape index: {}]   ;;  %s371_s5 = inlined_call_operand.vmem [shape: f32[1,32], index: 5, kind: input, shape index: {}]   ;;  %s372_s6 = inlined_call_operand.vmem [shape: f32[1,32], index: 6, kind: input, shape index: {}]   ;;  %s373_s7 = inlined_call_operand.vmem [shape: f32[16,32], index: 7, kind: output, shape index: {}]  }
   0x1   :  { %v254_v0 = vld [vmem:[%s366_s1 + $0x8] sm:$0xff]  ;;  %v253_v1 = vld [vmem:[%s366_s1] sm:$0xff]  ;;  %v258_v3 = vld [vmem:[%s369_s3 + $0x18] sm:$0xff]  ;;  %32 = vst.msk [vmem:[#allocation2] sm:$0xff] %vm31_vm0, %v271_v7  ;;  %265 = vrcp.f32 %v272_v34 }
   0x2   :  { %71 = vmatpush.bf16.msra.mxu0 %v254_v0  ;;  %v252_v2 = vld [vmem:[%s368_s0] sm:$0xff]  ;;  %124 = vmatpush.bf16.msra.mxu1 %v258_v3  ;;  %v257_v4 = vld [vmem:[%s369_s3 + $0x10] sm:$0xff]  ;;  %v256_v5 = vld [vmem:[%s369_s3 + $0x8] sm:$0xff]  ;;  %33 = vst.msk [vmem:[#allocation2 + $0x8] sm:$0xff] %vm31_vm0, %v271_v7 }
   0x3   :  { %v255_v6 = vld [vmem:[%s369_s3] sm:$0xff] }
   0x4   :  { %v261_v9 = vld [vmem:[%s367_s2] ss:$0 sm:$0xff] }
   0x5   :  { %v34_v20 = vld [vmem:[%s368_s0] sm:$0xff]  }
   0x6   :  { %72 = vmatpush.bf16.msra.mxu0 %v253_v1  ;;  %125 = vmatpush.bf16.msra.mxu1 %v257_v4  ;;  %v262_v21 = vld [vmem:[%s370_s4] ss:$0 sm:$0xff]  ;;  %v149_v24 = vunpack.c.l.bf16 %v34_v20  ;;  %v150_v29 = vunpack.c.h.bf16 %v34_v20 }
   0x7   :  { %v266_v35 = vpop.eup %265  ;;  %v263_v1 = vld [vmem:[%s371_s5] ss:$0 sm:$0xff] }
   0x8   :  { %v82_v16 = vld [vmem:[#allocation2] sm:$0xff]  ;;  %v160_v36 = vmul.f32 32.0, %v266_v35  ;;  %vm164_vm2 = vweird.f32 %v266_v35 }
   0x9   :  { %234 = vmatmul.msk.bf16.vlgmr.msra.gmra.mxu0 %vm31_vm0, %v252_v2  ;;  %v83_v19 = vld [vmem:[#allocation2 + $0x8] sm:$0xff]  ;;  %v264_v4 = vld [vmem:[%s372_s6] ss:$0 sm:$0xff] }
   0xa   :  { %126 = vmatpush.bf16.msra.mxu1 %v256_v5  ;;  %v161_v37 = vsub.f32 1.0, %v160_v36 }
   0xc   :  { %v162_v38 = vmul.f32 %v266_v35, %v161_v37 }
   0xe   :  { %127 = vmatpush.bf16.msra.mxu1 %v255_v6  ;;  %v163_v39 = vadd.f32 %v266_v35, %v162_v38 }
  0x10   :  { %v165_v40 = vsel %vm164_vm2, %v266_v35, %v163_v39 }
  0x86   :  { %v74_v8 = vpop.f32.mrf.mxu0 }
  0x87   :  { %v75_v10 = vadd.f32 %v261_v9, %v74_v8 }
  0x89   :  { %v79_v13 = vmax.f32 %v75_v10, 0.0 }
  0x8e   :  { %v76_v11 = vpop.f32.mrf.mxu0 }
  0x8f   :  { %v77_v12 = vadd.f32 %v261_v9, %v76_v11 }
  0x91   :  { %v80_v14 = vmax.f32 %v77_v12, 0.0 }
  0x93   :  { %v81_v15 = vpack.c.bf16 %v80_v14, %v79_v13 }
  0x95   :  { %251 = vmatmul.msk.bf16.vlgmr.msra.gmra.mxu1 %vm116_vm1, %v81_v15 }
 0x112   :  { %v129_v17 = vpop.f32.mrf.mxu1 }
 0x113   :  { %v134_v18 = vadd.f32 %v129_v17, %v82_v16 }
 0x115   :  { %136 = vst.msk [vmem:[#allocation2] sm:$0xff] %vm31_vm0, %v134_v18 }
 0x11a   :  { %v131_v22 = vpop.f32.mrf.mxu1 }
 0x11b   :  { %v135_v23 = vadd.f32 %v131_v22, %v83_v19 }
 0x11c   :  { %v141_v25 = vld [vmem:[#allocation2] sm:$0xff] }
 0x11d   :  { %137 = vst.msk [vmem:[#allocation2 + $0x8] sm:$0xff] %vm31_vm0, %v135_v23  ;;  %v147_v26 = vadd.f32 %v262_v21, %v141_v25 }
 0x11f   :  { %v151_v27 = vadd.f32 %v149_v24, %v147_v26 }
 0x121   :  { %v153_v28 = vsel %vm31_vm0, %v151_v27, 0.0 }
 0x122   :  { %154 = vadd.xlane.f32.xlu0 %v153_v28 }
 0x124   :  { %v142_v30 = vld [vmem:[#allocation2 + $0x8] sm:$0xff] }
 0x125   :  { %v148_v31 = vadd.f32 %v262_v21, %v142_v30 }
 0x127   :  { %v152_v32 = vadd.f32 %v150_v29, %v148_v31 }
 0x129   :  { %v156_v33 = vsel %vm31_vm0, %v152_v32, 0.0 }
 0x12a   :  { %157 = vadd.xlane.f32.xlu0 %v156_v33 }
 0x195   :  { %v155_v41 = vpop.xlane.xlu0 %154 }
 0x196   :  { %v166_v42 = vmul.f32 %v165_v40, %v155_v41 }
 0x198   :  { %v168_v43 = vsub.f32 %v151_v27, %v166_v42 }
 0x19a   :  { %v170_v44 = vmul.f32 %v168_v43, %v168_v43 }
 0x19c   :  { %v172_v45 = vsel %vm31_vm0, %v170_v44, 0.0 }
 0x19d   :  { %173 = vadd.xlane.f32.xlu1 %v172_v45  ;;  %v158_v46 = vpop.xlane.xlu0 %157 }
 0x19e   :  { %v167_v47 = vmul.f32 %v165_v40, %v158_v46 }
 0x1a0   :  { %v169_v48 = vsub.f32 %v152_v32, %v167_v47 }
 0x1a2   :  { %v171_v49 = vmul.f32 %v169_v48, %v169_v48 }
 0x1a4   :  { %v175_v50 = vsel %vm31_vm0, %v171_v49, 0.0 }
 0x1a5   :  { %176 = vadd.xlane.f32.xlu1 %v175_v50 }
 0x210   :  { %v174_v51 = vpop.xlane.xlu1 %173 }
 0x211   :  { %v178_v52 = vmul.f32 %v174_v51, %v165_v40 }
 0x213   :  { %v180_v53 = vadd.f32 1e-05, %v178_v52 }
 0x215   :  { %267 = vrsqrt.f32 %v180_v53  ;;  %vm188_vm4 = vweird.f32 %v180_v53 }
 0x218   :  { %v177_v54 = vpop.xlane.xlu1 %176 }
 0x219   :  { %v179_v55 = vmul.f32 %v177_v54, %v165_v40 }
 0x21b   :  { %v268_v56 = vpop.eup %267  ;;  %v181_v57 = vadd.f32 1e-05, %v179_v55 }
 0x21c   :  { %v183_v58 = vmul.f32 %v268_v56, %v180_v53  ;;  %vm189_vm3 = vweird.f32 %v268_v56 }
 0x21d   :  { %269 = vrsqrt.f32 %v181_v57  ;;  %vm190_vm5 = vmor %vm188_vm4, %vm189_vm3  ;;  %vm198_vm7 = vweird.f32 %v181_v57 }
 0x21e   :  { %v184_v59 = vmul.f32 %v268_v56, %v183_v58 }
 0x220   :  { %v185_v60 = vmul.f32 0.5, %v184_v59 }
 0x222   :  { %v186_v61 = vsub.f32 1.5, %v185_v60 }
 0x223   :  { %v270_v62 = vpop.eup %269 }
 0x224   :  { %v187_v63 = vmul.f32 %v268_v56, %v186_v61  ;;  %v193_v0 = vmul.f32 %v270_v62, %v181_v57  ;;  %vm199_vm6 = vweird.f32 %v270_v62 }
 0x225   :  { %vm200_vm8 = vmor %vm198_vm7, %vm199_vm6 }
 0x226   :  { %v191_v2 = vsel %vm190_vm5, %v268_v56, %v187_v63  ;;  %v194_v3 = vmul.f32 %v270_v62, %v193_v0 }
 0x227   :  { %v202_v5 = vmul.f32 %v191_v2, %v168_v43 }
 0x228   :  { %v195_v6 = vmul.f32 0.5, %v194_v3 }
 0x229   :  { %v208_v7 = vmul.f32 %v263_v1, %v202_v5 }
 0x22a   :  { %v196_v8 = vsub.f32 1.5, %v195_v6 }
 0x22b   :  { %v214_v9 = vadd.f32 %v264_v4, %v208_v7 }
 0x22c   :  { %v197_v10 = vmul.f32 %v270_v62, %v196_v8 }
 0x22d   :  { %216 = vst.msk [vmem:[%s373_s7] sm:$0xff] %vm31_vm0, %v214_v9 }
 0x22e   :  { %v201_v11 = vsel %vm200_vm8, %v270_v62, %v197_v10 }
 0x22f   :  { %v203_v12 = vmul.f32 %v201_v11, %v169_v48 }
 0x231   :  { %v209_v13 = vmul.f32 %v263_v1, %v203_v12 }
 0x233   :  { %v215_v14 = vadd.f32 %v264_v4, %v209_v13 }
 0x235   :  { %217 = vst.msk [vmem:[%s373_s7 + $0x8] sm:$0xff] %vm31_vm0, %v215_v14 }

</bundles_post_ra>
